<compile_context>
chip_gen: v6e
topology: v6e:2x2x1
jax: 0.10.0
libtpu: 0.0.40
codegen_flags: <defaults>
</compile_context>

<pallas_src>
import jax
import jax.numpy as jnp
from jax.experimental import pallas as pl
from jax.experimental.pallas import tpu as pltpu

_LANE = 128
_SUBLANE = 8
_SMALL_BATCH = 64        # <= this: plain-JAX path beats kernel launch overhead
_MULTI_TILE_BATCH = 256  # >= this: force >=2 grid steps (v7x megacore split)


def _round_up(n, m):
    return ((n + m - 1) // m) * m


def _mlp_kernel(x_ref,
                w1_ref, b1_ref,
                w2_ref, b2_ref,
                w3_ref, b3_ref,
                w4_ref, b4_ref,
                o_ref):
    x = x_ref[...]

    h = jnp.dot(x, w1_ref[...], preferred_element_type=jnp.float32) + b1_ref[...]
    h = jnp.maximum(h, 0.0)

    h = jnp.dot(h, w2_ref[...], preferred_element_type=jnp.float32) + b2_ref[...]
    h = jnp.maximum(h, 0.0)

    h = jnp.dot(h, w3_ref[...], preferred_element_type=jnp.float32) + b3_ref[...]
    h = jnp.maximum(h, 0.0)

    out = jnp.dot(h, w4_ref[...], preferred_element_type=jnp.float32) + b4_ref[...]
    o_ref[...] = out.astype(o_ref.dtype)


def teacher_reference(x, params):
    """Plain-JAX reference (also the tiny-batch fast path)."""
    (w1, b1), (w2, b2), (w3, b3), (w4, b4) = params
    h = jnp.maximum(x @ w1 + b1, 0.0)
    h = jnp.maximum(h @ w2 + b2, 0.0)
    h = jnp.maximum(h @ w3 + b3, 0.0)
    return h @ w4 + b4


def teacher_forward(x, params, *, tile_m=2048):
    """Fused teacher MLP forward. x: (batch, inputs) f32."""
    (w1, b1), (w2, b2), (w3, b3), (w4, b4) = params
    batch, inputs = x.shape
    d1, d2, d3 = w1.shape[1], w2.shape[1], w3.shape[1]
    num_classes = w4.shape[1]

    # Tiny batch: whole MLP is ~1 MFLOP; XLA's fused dot path is as fast or
    # faster than pallas_call launch + pad/slice copies.
    if batch <= _SMALL_BATCH:
        return teacher_reference(x, params)

    # --- pad final output lane dim to a multiple of 128 (lane-dense stores) ---
    nc_pad = _round_up(num_classes, _LANE)
    if nc_pad != num_classes:
        w4p = jnp.pad(w4, ((0, 0), (0, nc_pad - num_classes)))
        b4p = jnp.pad(b4, ((0, 0), (0, nc_pad - num_classes)))
    else:
        w4p, b4p = w4, b4

    # --- even batch partitioning: padding bounded to <8 rows per tile ---
    min_tiles = 2 if batch >= _MULTI_TILE_BATCH else 1   # engage 2nd TC on v7x
    n_tiles = max(min_tiles, pl.cdiv(batch, tile_m))
    tm = _round_up(pl.cdiv(batch, n_tiles), _SUBLANE)
    batch_pad = n_tiles * tm
    xp = jnp.pad(x, ((0, batch_pad - batch), (0, 0))) if batch_pad != batch else x

    def resident(a):
        zeros = (0,) * a.ndim
        return pl.BlockSpec(a.shape, lambda i, z=zeros: z)   # VMEM-resident

    flops = 2 * batch_pad * (inputs * d1 + d1 * d2 + d2 * d3 + d3 * nc_pad)
    bytes_accessed = 4 * (xp.size
                          + w1.size + b1.size + w2.size + b2.size
                          + w3.size + b3.size + w4p.size + b4p.size
                          + batch_pad * nc_pad)

    out = pl.pallas_call(
        _mlp_kernel,
        out_shape=jax.ShapeDtypeStruct((batch_pad, nc_pad), jnp.float32),
        grid=(n_tiles,),
        in_specs=[
            pl.BlockSpec((tm, inputs), lambda i: (i, 0)),   # activations: tiled
            resident(w1), resident(b1),                     # weights: VMEM-resident
            resident(w2), resident(b2),
            resident(w3), resident(b3),
            resident(w4p), resident(b4p),
        ],
        out_specs=pl.BlockSpec((tm, nc_pad), lambda i: (i, 0)),
        compiler_params=pltpu.CompilerParams(
            dimension_semantics=("parallel",),
            vmem_limit_bytes=32 * 1024 * 1024),
        cost_estimate=pl.CostEstimate(
            flops=flops, transcendentals=0, bytes_accessed=bytes_accessed),
    )(xp, w1, b1, w2, b2, w3, b3, w4p, b4p)

    # Padded batch rows / class columns are dropped here; consumers needing the
    # raw (batch_pad, 128) slab could skip this slice to avoid the HBM copy.
    return out[:batch, :num_classes]


def init_teacher_params(key, inputs, num_classes):
    """Deterministic init matching the module's layer shapes.
    Weights stored as (in_features, out_features); biases as (1, out)."""
    dims = [(inputs, 128), (128, 256), (256, 128), (128, num_classes)]
    params = []
    for fan_in, fan_out in dims:
        kw, kb, key = jax.random.split(key, 3)
        bound = 1.0 / jnp.sqrt(fan_in)
        w = jax.random.uniform(kw, (fan_in, fan_out), jnp.float32, -bound, bound)
        b = jax.random.uniform(kb, (1, fan_out), jnp.float32, -bound, bound)
        params.append((w, b))
    return params


if __name__ == "__main__":
    inputs = 32
    num_classes = 10

    key = jax.random.PRNGKey(0)
    kx, kx2, kp = jax.random.split(key, 3)
    params = init_teacher_params(kp, inputs, num_classes)

    # Small batch: exercises the plain-JAX fallback path.
    batch = 8
    x = jax.random.normal(kx, (batch, inputs), jnp.float32)
    out = jax.block_until_ready(teacher_forward(x, params))
    ref = teacher_reference(x, params)
    assert out.shape == (batch, num_classes)
    assert jnp.allclose(out, ref, atol=1e-5, rtol=1e-5), "mismatch vs reference (batch=8)"

    # Larger, non-multiple batch: Pallas kernel path (2 grid steps, even split,
    # 4 padded rows instead of 212).
    batch2 = 300
    x2 = jax.random.normal(kx2, (batch2, inputs), jnp.float32)
    out2 = jax.block_until_ready(teacher_forward(x2, params))
    ref2 = teacher_reference(x2, params)
    assert out2.shape == (batch2, num_classes)
    assert jnp.allclose(out2, ref2, atol=1e-5, rtol=1e-5), "mismatch vs reference (batch=300)"

    print("KERNEL_OK")
</pallas_src>

<mosaic_0001>
module attributes {stable_mosaic.version = 11 : i64} {
  func.func @_mlp_kernel(%arg0: i32, %arg1: memref<152x32xf32, #tpu.memory_space<vmem>>, %arg2: memref<32x128xf32, #tpu.memory_space<vmem>>, %arg3: memref<1x128xf32, #tpu.memory_space<vmem>>, %arg4: memref<128x256xf32, #tpu.memory_space<vmem>>, %arg5: memref<1x256xf32, #tpu.memory_space<vmem>>, %arg6: memref<256x128xf32, #tpu.memory_space<vmem>>, %arg7: memref<1x128xf32, #tpu.memory_space<vmem>>, %arg8: memref<128x128xf32, #tpu.memory_space<vmem>>, %arg9: memref<1x128xf32, #tpu.memory_space<vmem>>, %arg10: memref<152x128xf32, #tpu.memory_space<vmem>>) attributes {dimension_semantics = [#tpu.dimension_semantics<parallel>], iteration_bounds = array<i64: 2>, scalar_prefetch = 0 : i64, scratch_operands = 0 : i64, tpu.core_type = #tpu.core_type<tc>, window_params = [{transform_indices = @transform_0, window_bounds = array<i64: 152, 32>}, {pipeline_mode = #tpu.pipeline_mode<synchronous>, transform_indices = @transform_1, window_bounds = array<i64: 32, 128>}, {pipeline_mode = #tpu.pipeline_mode<synchronous>, transform_indices = @transform_2, window_bounds = array<i64: 1, 128>}, {pipeline_mode = #tpu.pipeline_mode<synchronous>, transform_indices = @transform_3, window_bounds = array<i64: 128, 256>}, {pipeline_mode = #tpu.pipeline_mode<synchronous>, transform_indices = @transform_4, window_bounds = array<i64: 1, 256>}, {pipeline_mode = #tpu.pipeline_mode<synchronous>, transform_indices = @transform_5, window_bounds = array<i64: 256, 128>}, {pipeline_mode = #tpu.pipeline_mode<synchronous>, transform_indices = @transform_6, window_bounds = array<i64: 1, 128>}, {pipeline_mode = #tpu.pipeline_mode<synchronous>, transform_indices = @transform_7, window_bounds = array<i64: 128, 128>}, {pipeline_mode = #tpu.pipeline_mode<synchronous>, transform_indices = @transform_8, window_bounds = array<i64: 1, 128>}, {transform_indices = @transform_9, window_bounds = array<i64: 152, 128>}]} {
    %c0 = arith.constant 0 : index
    %c0_0 = arith.constant 0 : index
    %0 = vector.load %arg1[%c0, %c0_0] : memref<152x32xf32, #tpu.memory_space<vmem>>, vector<152x32xf32>
    %c0_1 = arith.constant 0 : index
    %c0_2 = arith.constant 0 : index
    %1 = vector.load %arg2[%c0_1, %c0_2] : memref<32x128xf32, #tpu.memory_space<vmem>>, vector<32x128xf32>
    %cst = arith.constant dense<0.000000e+00> : vector<152x128xf32>
    %2 = tpu.matmul %0, %1, %cst {dimension_numbers = #tpu.dot_dimension_numbers<[1], [0], [0], [1], [0, 0, 1, 1], [], []>} : vector<152x32xf32>, vector<32x128xf32>, vector<152x128xf32> -> vector<152x128xf32>
    %c0_3 = arith.constant 0 : index
    %c0_4 = arith.constant 0 : index
    %3 = vector.load %arg3[%c0_3, %c0_4] : memref<1x128xf32, #tpu.memory_space<vmem>>, vector<1x128xf32>
    %4 = vector.broadcast %3 : vector<1x128xf32> to vector<152x128xf32>
    %5 = arith.addf %2, %4 : vector<152x128xf32>
    %cst_5 = arith.constant 0.000000e+00 : f32
    %6 = vector.broadcast %cst_5 : f32 to vector<152x128xf32>
    %7 = arith.maximumf %5, %6 : vector<152x128xf32>
    %c0_6 = arith.constant 0 : index
    %c0_7 = arith.constant 0 : index
    %8 = vector.load %arg4[%c0_6, %c0_7] : memref<128x256xf32, #tpu.memory_space<vmem>>, vector<128x256xf32>
    %cst_8 = arith.constant dense<0.000000e+00> : vector<152x256xf32>
    %9 = tpu.matmul %7, %8, %cst_8 {dimension_numbers = #tpu.dot_dimension_numbers<[1], [0], [0], [1], [0, 0, 1, 1], [], []>} : vector<152x128xf32>, vector<128x256xf32>, vector<152x256xf32> -> vector<152x256xf32>
    %c0_9 = arith.constant 0 : index
    %c0_10 = arith.constant 0 : index
    %10 = vector.load %arg5[%c0_9, %c0_10] : memref<1x256xf32, #tpu.memory_space<vmem>>, vector<1x256xf32>
    %11 = vector.broadcast %10 : vector<1x256xf32> to vector<152x256xf32>
    %12 = arith.addf %9, %11 : vector<152x256xf32>
    %cst_11 = arith.constant 0.000000e+00 : f32
    %13 = vector.broadcast %cst_11 : f32 to vector<152x256xf32>
    %14 = arith.maximumf %12, %13 : vector<152x256xf32>
    %c0_12 = arith.constant 0 : index
    %c0_13 = arith.constant 0 : index
    %15 = vector.load %arg6[%c0_12, %c0_13] : memref<256x128xf32, #tpu.memory_space<vmem>>, vector<256x128xf32>
    %cst_14 = arith.constant dense<0.000000e+00> : vector<152x128xf32>
    %16 = tpu.matmul %14, %15, %cst_14 {dimension_numbers = #tpu.dot_dimension_numbers<[1], [0], [0], [1], [0, 0, 1, 1], [], []>} : vector<152x256xf32>, vector<256x128xf32>, vector<152x128xf32> -> vector<152x128xf32>
    %c0_15 = arith.constant 0 : index
    %c0_16 = arith.constant 0 : index
    %17 = vector.load %arg7[%c0_15, %c0_16] : memref<1x128xf32, #tpu.memory_space<vmem>>, vector<1x128xf32>
    %18 = vector.broadcast %17 : vector<1x128xf32> to vector<152x128xf32>
    %19 = arith.addf %16, %18 : vector<152x128xf32>
    %cst_17 = arith.constant 0.000000e+00 : f32
    %20 = vector.broadcast %cst_17 : f32 to vector<152x128xf32>
    %21 = arith.maximumf %19, %20 : vector<152x128xf32>
    %c0_18 = arith.constant 0 : index
    %c0_19 = arith.constant 0 : index
    %22 = vector.load %arg8[%c0_18, %c0_19] : memref<128x128xf32, #tpu.memory_space<vmem>>, vector<128x128xf32>
    %cst_20 = arith.constant dense<0.000000e+00> : vector<152x128xf32>
    %23 = tpu.matmul %21, %22, %cst_20 {dimension_numbers = #tpu.dot_dimension_numbers<[1], [0], [0], [1], [0, 0, 1, 1], [], []>} : vector<152x128xf32>, vector<128x128xf32>, vector<152x128xf32> -> vector<152x128xf32>
    %c0_21 = arith.constant 0 : index
    %c0_22 = arith.constant 0 : index
    %24 = vector.load %arg9[%c0_21, %c0_22] : memref<1x128xf32, #tpu.memory_space<vmem>>, vector<1x128xf32>
    %25 = vector.broadcast %24 : vector<1x128xf32> to vector<152x128xf32>
    %26 = arith.addf %23, %25 : vector<152x128xf32>
    %c0_23 = arith.constant 0 : index
    %c0_24 = arith.constant 0 : index
    %27 = vector.load %arg10[%c0_23, %c0_24] : memref<152x128xf32, #tpu.memory_space<vmem>>, vector<152x128xf32>
    tpu.vector_store %arg10[%c0_23, %c0_24], %26 {strides = array<i32>} : memref<152x128xf32, #tpu.memory_space<vmem>>, vector<152x128xf32>,
    return
  }
  func.func @transform_0(%arg0: i32) -> (i32, i32) {
    %c0_i32 = arith.constant 0 : i32
    %c0_i32_0 = arith.constant 0 : i32
    return %arg0, %c0_i32 : i32, i32
  }
  func.func @transform_1(%arg0: i32) -> (i32, i32) {
    %c0_i32 = arith.constant 0 : i32
    %c0_i32_0 = arith.constant 0 : i32
    %c0_i32_1 = arith.constant 0 : i32
    return %c0_i32, %c0_i32_0 : i32, i32
  }
  func.func @transform_2(%arg0: i32) -> (i32, i32) {
    %c0_i32 = arith.constant 0 : i32
    %c0_i32_0 = arith.constant 0 : i32
    %c0_i32_1 = arith.constant 0 : i32
    return %c0_i32, %c0_i32_0 : i32, i32
  }
  func.func @transform_3(%arg0: i32) -> (i32, i32) {
    %c0_i32 = arith.constant 0 : i32
    %c0_i32_0 = arith.constant 0 : i32
    %c0_i32_1 = arith.constant 0 : i32
    return %c0_i32, %c0_i32_0 : i32, i32
  }
  func.func @transform_4(%arg0: i32) -> (i32, i32) {
    %c0_i32 = arith.constant 0 : i32
    %c0_i32_0 = arith.constant 0 : i32
    %c0_i32_1 = arith.constant 0 : i32
    return %c0_i32, %c0_i32_0 : i32, i32
  }
  func.func @transform_5(%arg0: i32) -> (i32, i32) {
    %c0_i32 = arith.constant 0 : i32
    %c0_i32_0 = arith.constant 0 : i32
    %c0_i32_1 = arith.constant 0 : i32
    return %c0_i32, %c0_i32_0 : i32, i32
  }
  func.func @transform_6(%arg0: i32) -> (i32, i32) {
    %c0_i32 = arith.constant 0 : i32
    %c0_i32_0 = arith.constant 0 : i32
    %c0_i32_1 = arith.constant 0 : i32
    return %c0_i32, %c0_i32_0 : i32, i32
  }
  func.func @transform_7(%arg0: i32) -> (i32, i32) {
    %c0_i32 = arith.constant 0 : i32
    %c0_i32_0 = arith.constant 0 : i32
    %c0_i32_1 = arith.constant 0 : i32
    return %c0_i32, %c0_i32_0 : i32, i32
  }
  func.func @transform_8(%arg0: i32) -> (i32, i32) {
    %c0_i32 = arith.constant 0 : i32
    %c0_i32_0 = arith.constant 0 : i32
    %c0_i32_1 = arith.constant 0 : i32
    return %c0_i32, %c0_i32_0 : i32, i32
  }
  func.func @transform_9(%arg0: i32) -> (i32, i32) {
    %c0_i32 = arith.constant 0 : i32
    %c0_i32_0 = arith.constant 0 : i32
    return %arg0, %c0_i32 : i32, i32
  }
}

</mosaic_0001>

<bundles_post_ra>
// kernel: tpu_custom_call.1
= control target key start
LH: loop header
LB: loop body
LE: loop exit
PB: predicated region body
PF: predicated region fallthrough
CT: control target
= control target key end

     0   :  { %14 = vsyncpa [#allocation3], 0  ;;  %s2617_s0 = inlined_call_operand.vmem [shape: f32[304,32], index: 0, kind: input, shape index: {}]   ;;  %s2618_s1 = inlined_call_operand.hbm [shape: f32[32,128], index: 1, kind: input, shape index: {}]   ;;  %s2619_s2 = inlined_call_operand.vmem [shape: f32[1,128], index: 2, kind: input, shape index: {}]   ;;  %s2620_s3 = inlined_call_operand.vmem [shape: f32[128,256], index: 3, kind: input, shape index: {}]   ;;  %s2621_s4 = inlined_call_operand.vmem [shape: f32[1,256], index: 4, kind: input, shape index: {}]   ;;  %s2622_s5 = inlined_call_operand.hbm [shape: f32[256,128], index: 5, kind: input, shape index: {}]   ;;  %s2623_s6 = inlined_call_operand.vmem [shape: f32[1,128], index: 6, kind: input, shape index: {}]   ;;  %s2624_s7 = inlined_call_operand.vmem [shape: f32[128,128], index: 7, kind: input, shape index: {}]   ;;  %s2625_s8 = inlined_call_operand.vmem [shape: f32[1,128], index: 8, kind: input, shape index: {}]   ;;  %s2626_s9 = inlined_call_operand.hbm [shape: f32[304,128], index: 9, kind: output, shape index: {}]  }
   0x1   :  { %15 = vsyncpa [#allocation6], 0 }
   0x2   :  { %16 = vsyncpa [#allocation4], 0 }
   0x3   :  { %18 = vsyncpa [#allocation4 + $0x1], 0  ;;  %s1937_s30 = smov 0   ;;  %s1939_s10 = smov 0  }
   0x4   :  { %s1941_s11 = smov 0   ;;  %s1943_s12 = smov 0  }
   0x5 LB: > { %s1958_s13 = sadd.s32 4294967295, %s1876_s12   ;;  %s1410_s14 = sadd.s32 4294967294, %s1876_s12   ;;  %s1876_s12 = sphi %s1943_s12, %s2640_s12   ;;  %s1872_s11 = sphi %s1941_s11, %s2639_s11   ;;  %s1868_s10 = sphi %s1939_s10, %s2638_s10   ;;  %s1864_s30 = sphi %s1937_s30, %s2637_s30  }
   0x6   : > { %s1962_s15 = sadd.s32 1, %s1876_s12   ;;  %s225_s16 = sadd.s32 1, %s1872_s11 }
   0x7   : > { %s222_s17 = ssub.s32 %s1876_s12, %s1962_s15  ;;  %p235_p0 = scmp.ne.s32.totalorder %s1872_s11, %s1868_s10 }
   0x8   : > { %p223_p1 = scmp.eq.s32.totalorder %s222_s17, 0  ;;  %p236_p2 = scmp.eq.s32.totalorder %s1958_s13, 1 }
   0x9   : > { %p241_p3 = scmp.ne.s32.totalorder %s1868_s10, %s1864_s30  ;;  %p242_p4 = scmp.eq.s32.totalorder %s1410_s14, 1 }
   0xa   : > { %s1973_s18 = scalar_select %p223_p1, %s1872_s11, %s225_s16  }
   0xb   : > { %p1975_p5 = por %p236_p2, %p235_p0  ;;  %p1979_p6 = por %p242_p4, %p241_p3 }
   0xc   : > { %p1411_p7 = scmp.ge.s32.totalorder %s1876_s12, 1  ;;  %p249_p8 = scmp.lt.s32.totalorder %s1876_s12, 3 }
   0xd   : > { %s2629_s20 = scalar_select %p1979_p6, 1, 0 }
   0xe   : > { %p2627_p9 = scmp.eq.s32.totalorder %s1958_s13, 0  ;;  %p1986_p10 = pnand %p1411_p7, %p249_p8 }
   0xf   : > { %s1878_s22 = smov [#allocation2]   ;;  %s1879_s25 = smov [#allocation5]  }
  0x10   : > { %s261_s23 = sshll.u32 %s1878_s22, 4  ;;  %p1700_p11 = pneg %p1986_p10  ;;  %s262_s23 = int_to_ptr.vmem [resolvable:$true] %s261_s23 }
  0x11   : > { %s283_s26 = sshll.u32 %s1879_s25, 4  ;;  %s1767_s27 = scalar_lea.vmem %s262_s23, 512  ;;  %s284_s26 = int_to_ptr.vmem [resolvable:$true] %s283_s26 }
  0x12   : > { %p1994_p12 = pnand %p2627_p9, %p1700_p11  ;;  %p1768_p0 = scmp.ne.s32.totalorder %s262_s23, %s1767_s27 }
  0x13   : > { %p1775_p3 = scmp.lt.s32.totalorder %s262_s23, %s262_s23  ;;  %p1776_p4 = scmp.lt.s32.totalorder %s1767_s27, %s1767_s27 }
  0x14   : > { %p1758_p13 = pneg %p1994_p12 }
  0x15   : > { %p1777_p7 = por %p1776_p4, %p1775_p3 }
  0x16   : > { %p1770_p1 = pnand %p1768_p0, %p1758_p13 }
  0x18   : > { %p1771_p2 = pneg %p1770_p1 }
  0x1a   : > { %p1778_p8 = pnand %p1777_p7, %p1771_p2 }
  0x1c   : > { %1781 = shalt.err (!%p1778_p8)
}
  0x1d   : > { %s1880_s28 = smov 128   ;;  %s1881_s29 = smov 8  }
  0x1e   : > { %1703 = dma.hbm_to_vmem [thread:$0]  (!%p1994_p12), %s2618_s1, 512, %s262_s23, [#allocation3], %s1880_s28, %s1880_s28, %s1881_s29  }
  0x1f   : > { %s1793_s17 = scalar_lea.vmem %s284_s26, 4096  ;;  %p1801_p9 = scmp.lt.s32.totalorder %s284_s26, %s284_s26 }
  0x20   : > { %p1794_p11 = scmp.ne.s32.totalorder %s284_s26, %s1793_s17  ;;  %p1802_p6 = scmp.lt.s32.totalorder %s1793_s17, %s1793_s17 }
  0x22   : > { %p1796_p0 = pnand %p1794_p11, %p1758_p13  ;;  %p1803_p3 = por %p1802_p6, %p1801_p9 }
  0x24   : > { %p1797_p1 = pneg %p1796_p0 }
  0x26   : > { %p1804_p2 = pnand %p1803_p3, %p1797_p1 }
  0x28   : > { %1807 = shalt.err (!%p1804_p2)
}
  0x29   : > { %1706 = dma.hbm_to_vmem [thread:$0]  (!%p1994_p12), %s2622_s5, 4096, %s284_s26, [#allocation6], %s1880_s28, %s1880_s28, %s1881_s29  }
  0x2a   : > { %317 = sbr.rel (%p1986_p10) target bundleno = 935 (0x3a7), region = 56  ;;  %p2632_p4 = scmp.eq.s32.totalorder (!%p1986_p10), %s1958_s13, 0 }
  0x2f   : > { %1851 = dma.done.wait (%p2632_p4), [#allocation3], 512   ;;  %p2633_p13 = pmov %p2632_p4 }
  0x30   : > { %p2634_p7 = pmov %p2632_p4 }
  0x31   : > { %1853 = vsyncadd (%p2633_p13), [#allocation3], 4294966784 }
  0x32   : > { %1855 = dma.done.wait (%p2634_p7), [#allocation6], 4096   ;;  %p2635_p6 = pmov %p2632_p4 }
  0x33   : > { %s357_s23 = smul.u32 19, %s1958_s13  ;;  %v1882_v0 = vmov 0.0   ;;  %vm1883_vm0 = vmmov 0   ;;  %v386_v1 = vld [vmem:[#allocation2 + $0x18] sm:$0xff]  ;;  %v385_v2 = vld [vmem:[#allocation2 + $0x10] sm:$0xff]  ;;  %v384_v3 = vld [vmem:[#allocation2 + $0x8] sm:$0xff] }
  0x34   : > { %1857 = vsyncadd (%p2635_p6), [#allocation6], 4294963200  ;;  %1503 = vmatprep.subr.mxu0 %v1882_v0  ;;  %1511 = vmatprep.mubr.msk.f32.mxu0 %vm1883_vm0, %v1882_v0  ;;  %v383_v4 = vld [vmem:[#allocation2] sm:$0xff]  ;;  %vm394_vm1 = vcmask 261120   ;;  %v662_v6 = vld [vmem:[%s2620_s3 + $0xf8] sm:$0xff]  ;;  %s354_s26 = sand.u32 1, %s1868_s10  }
  0x35   : > { %p358_p9 = scmp.lt.s32.totalorder %s357_s23, 37  ;;  %739 = vmatprep.mubr.f32.mxu1 %v1882_v0  ;;  %1504 = vmatpush3.msra.mxu0 %v386_v1  ;;  %v661_v7 = vld [vmem:[%s2620_s3 + $0xf0] sm:$0xff]  ;;  %v660_v8 = vld [vmem:[%s2620_s3 + $0xe8] sm:$0xff]  ;;  %v659_v9 = vld [vmem:[%s2620_s3 + $0xe0] sm:$0xff]  ;;  %s1689_s28 = smul.u32 152, %s354_s26 }
  0x36   : > { %1505 = vmatprep.subr.mxu0 %v1882_v0  ;;  %675 = vmatprep.subr.mxu1 %v662_v6  ;;  %v658_v11 = vld [vmem:[%s2620_s3 + $0xd8] sm:$0xff]  ;;  %v657_v12 = vld [vmem:[%s2620_s3 + $0xd0] sm:$0xff]  ;;  %v656_v13 = vld [vmem:[%s2620_s3 + $0xc8] sm:$0xff]  ;;  %s1444_s17 = smul.u32 2432, %s1958_s13  ;;  %s2577_s13 = scalar_lea.sflag [#allocation4], %s354_s26 }
  0x37   : > { %s2642_s23 = smov (!%p358_p9, %s357_s23), 37  ;;  %1506 = vmatpush3.msra.mxu0 %v385_v2  ;;  %676 = vmatpush1.msra.mxu1 %v661_v7  ;;  %v655_v14 = vld [vmem:[%s2620_s3 + $0xc0] sm:$0xff]  ;;  %v654_v16 = vld [vmem:[%s2620_s3 + $0xb8] sm:$0xff]  ;;  %v653_v17 = vld [vmem:[%s2620_s3 + $0xb0] sm:$0xff]  ;;  %s2527_s16 = scalar_lea.vmem [#allocation7], %s1689_s28 }
  0x38   : > { %s1418_s21 = sshll.u32 %s2642_s23, 3  ;;  %1507 = vmatprep.subr.mxu0 %v1882_v0  ;;  %677 = vmatprep.subr.mxu1 %v660_v8  ;;  %v652_v18 = vld [vmem:[%s2620_s3 + $0xa8] sm:$0xff]  ;;  %v651_v19 = vld [vmem:[%s2620_s3 + $0xa0] sm:$0xff]  ;;  %v650_v21 = vld [vmem:[%s2620_s3 + $0x98] sm:$0xff]  ;;  %s1326_s22 = sshll.u32 %s2527_s16, 4  ;;  %s2571_s22 = int_to_ptr.vmem [resolvable:$true] %s1326_s22 }
  0x39   : > { %s2035_s27 = scalar_lea.vmem %s2617_s0, %s1418_s21  ;;  %1508 = vmatpush3.msra.mxu0 %v384_v3  ;;  %678 = vmatpush1.msra.mxu1 %v659_v9  ;;  %v649_v22 = vld [vmem:[%s2620_s3 + $0x90] sm:$0xff]  ;;  %v648_v23 = vld [vmem:[%s2620_s3 + $0x88] sm:$0xff]  ;;  %v647_v24 = vld [vmem:[%s2620_s3 + $0x80] sm:$0xff]  ;;  %s2569_s21 = scalar_lea.hbm %s2626_s9, %s1444_s17 }
  0x3a   : > { %v364_v5 = vld [vmem:[%s2035_s27] sm:$0xff]  ;;  %1509 = vmatprep.subr.mxu0 %v1882_v0  ;;  %v365_v10 = vld [vmem:[%s2035_s27 + $0x8] sm:$0xff]  ;;  %679 = vmatprep.subr.mxu1 %v658_v11  ;;  %v366_v15 = vld [vmem:[%s2035_s27 + $0x10] sm:$0xff]  ;;  %s1884_s24 = smov [#allocation7]  }
  0x3b   : > { %1510 = vmatpush3.msra.mxu0 %v383_v4  ;;  %680 = vmatpush1.msra.mxu1 %v657_v12  ;;  %v367_v20 = vld [vmem:[%s2035_s27 + $0x18] sm:$0xff]  ;;  %v368_v25 = vld [vmem:[%s2035_s27 + $0x20] sm:$0xff]  ;;  %v645_v27 = vld [vmem:[%s2620_s3 + $0x70] sm:$0xff]  ;;  %s1812_s28 = sshll.u32 %s1884_s24, 4  ;;  %s1813_s28 = int_to_ptr.vmem [resolvable:$false] %s1812_s28 }
  0x3c   : > { %1512 = vmatmul.mubr.msk.f32.vlgmr.msra.gmra.mxu0 %vm394_vm1, %v364_v5  ;;  %931 = vmatprep.subr.mxu0 %v1882_v0  ;;  %v646_v26 = vld [vmem:[%s2620_s3 + $0x78] sm:$0xff]  ;;  %v644_v28 = vld [vmem:[%s2620_s3 + $0x68] sm:$0xff]  ;;  %v643_v29 = vld [vmem:[%s2620_s3 + $0x60] sm:$0xff]  ;;  %s1814_s29 = scalar_lea.vmem %s1813_s28, 4864  ;;  %p1815_p11 = scmp.lt.s32.totalorder %s2571_s22, %s1813_s28 }
  0x3d   : > { %1514 = vmatprep.mubr.msk.f32.mxu0 %vm1883_vm0, %v1882_v0  ;;  %681 = vmatprep.subr.mxu1 %v656_v13  ;;  %v369_v30 = vld [vmem:[%s2035_s27 + $0x28] sm:$0xff]  ;;  %v642_v31 = vld [vmem:[%s2620_s3 + $0x58] sm:$0xff]  ;;  %v641_v32 = vld [vmem:[%s2620_s3 + $0x50] sm:$0xff] }
  0x3e   : > { %682 = vmatpush1.msra.mxu1 %v655_v14  ;;  %v640_v33 = vld [vmem:[%s2620_s3 + $0x48] sm:$0xff]  ;;  %v639_v34 = vld [vmem:[%s2620_s3 + $0x40] sm:$0xff]  ;;  %v370_v35 = vld [vmem:[%s2035_s27 + $0x30] sm:$0xff] }
  0x3f   : > { %683 = vmatprep.subr.mxu1 %v654_v16  ;;  %v638_v36 = vld [vmem:[%s2620_s3 + $0x38] sm:$0xff]  ;;  %v637_v37 = vld [vmem:[%s2620_s3 + $0x30] sm:$0xff]  ;;  %v636_v38 = vld [vmem:[%s2620_s3 + $0x28] sm:$0xff] }
  0x40   : > { %1515 = vmatmul.mubr.msk.f32.gmra.mxu0 %vm394_vm1, %v365_v10  ;;  %684 = vmatpush1.msra.mxu1 %v653_v17  ;;  %v371_v39 = vld [vmem:[%s2035_s27 + $0x38] sm:$0xff]  ;;  %v372_v40 = vld [vmem:[%s2035_s27 + $0x40] sm:$0xff]  ;;  %v373_v41 = vld [vmem:[%s2035_s27 + $0x48] sm:$0xff] }
  0x41   : > { %1517 = vmatprep.mubr.msk.f32.mxu0 %vm1883_vm0, %v1882_v0  ;;  %685 = vmatprep.subr.mxu1 %v652_v18  ;;  %v374_v42 = vld [vmem:[%s2035_s27 + $0x50] sm:$0xff]  ;;  %v375_v43 = vld [vmem:[%s2035_s27 + $0x58] sm:$0xff]  ;;  %v376_v44 = vld [vmem:[%s2035_s27 + $0x60] sm:$0xff] }
  0x42   : > { %686 = vmatpush1.msra.mxu1 %v651_v19  ;;  %v377_v45 = vld [vmem:[%s2035_s27 + $0x68] sm:$0xff]  ;;  %v378_v46 = vld [vmem:[%s2035_s27 + $0x70] sm:$0xff]  ;;  %v379_v47 = vld [vmem:[%s2035_s27 + $0x78] sm:$0xff] }
  0x43   : > { %687 = vmatprep.subr.mxu1 %v650_v21  ;;  %v380_v48 = vld [vmem:[%s2035_s27 + $0x80] sm:$0xff]  ;;  %v634_v50 = vld [vmem:[%s2620_s3 + $0x18] sm:$0xff]  ;;  %v381_v51 = vld [vmem:[%s2035_s27 + $0x88] sm:$0xff] }
  0x44   : > { %1518 = vmatmul.mubr.msk.f32.gmra.mxu0 %vm394_vm1, %v366_v15  ;;  %688 = vmatpush1.msra.mxu1 %v649_v22  ;;  %v635_v49 = vld [vmem:[%s2620_s3 + $0x20] sm:$0xff]  ;;  %v633_v52 = vld [vmem:[%s2620_s3 + $0x10] sm:$0xff]  ;;  %v632_v53 = vld [vmem:[%s2620_s3 + $0x8] sm:$0xff] }
  0x45   : > { %1520 = vmatprep.mubr.msk.f32.mxu0 %vm1883_vm0, %v1882_v0  ;;  %689 = vmatprep.subr.mxu1 %v648_v23  ;;  %v631_v54 = vld [vmem:[%s2620_s3] sm:$0xff]  ;;  %v382_v55 = vld [vmem:[%s2035_s27 + $0x90] sm:$0xff]  ;;  %v907_v56 = vld [vmem:[#allocation5 + $0x78] sm:$0xff]  ;;  %s1808_s27 = scalar_lea.vmem %s2571_s22, 2432 }
  0x46   : > { %690 = vmatpush1.msra.mxu1 %v647_v24  ;;  %v906_v57 = vld [vmem:[#allocation5 + $0x70] sm:$0xff]  ;;  %932 = vmatpush1.msra.mxu0 %v907_v56  ;;  %v905_v58 = vld [vmem:[#allocation5 + $0x68] sm:$0xff]  ;;  %v904_v59 = vld [vmem:[#allocation5 + $0x60] sm:$0xff]  ;;  %p1809_p10 = scmp.ne.s32.totalorder %s2571_s22, %s1808_s27  ;;  %p1816_p0 = scmp.lt.s32.totalorder %s1814_s29, %s1808_s27 }
  0x47   : > { %691 = vmatprep.subr.mxu1 %v646_v26  ;;  %933 = vmatprep.subr.mxu0 %v1882_v0  ;;  %v903_v60 = vld [vmem:[#allocation5 + $0x58] sm:$0xff]  ;;  %v902_v61 = vld [vmem:[#allocation5 + $0x50] sm:$0xff]  ;;  %v901_v62 = vld [vmem:[#allocation5 + $0x48] sm:$0xff] }
  0x48   : > { %1521 = vmatmul.mubr.msk.f32.gmra.mxu0 %vm394_vm1, %v367_v20  ;;  %692 = vmatpush1.msra.mxu1 %v645_v27  ;;  %v900_v63 = vld [vmem:[#allocation5 + $0x40] sm:$0xff]  ;;  %v899_v1 = vld [vmem:[#allocation5 + $0x38] sm:$0xff]  ;;  %v898_v2 = vld [vmem:[#allocation5 + $0x30] sm:$0xff]  ;;  %p1810_p12 = pnand %p1809_p10, %p1975_p5  ;;  %p1817_p1 = por %p1816_p0, %p1815_p11 }
  0x49   : > { %1523 = vmatprep.mubr.msk.f32.mxu0 %vm1883_vm0, %v1882_v0  ;;  %693 = vmatprep.subr.mxu1 %v644_v28  ;;  %v897_v3 = vld [vmem:[#allocation5 + $0x28] sm:$0xff]  ;;  %v896_v4 = vld [vmem:[#allocation5 + $0x20] sm:$0xff]  ;;  %v895_v5 = vld [vmem:[#allocation5 + $0x18] sm:$0xff] }
  0x4a   : > { %694 = vmatpush1.msra.mxu1 %v643_v29  ;;  %934 = vmatpush1.msra.mxu0 %v906_v57  ;;  %v894_v6 = vld [vmem:[#allocation5 + $0x10] sm:$0xff]  ;;  %v893_v7 = vld [vmem:[#allocation5 + $0x8] sm:$0xff]  ;;  %v892_v8 = vld [vmem:[#allocation5] sm:$0xff]  ;;  %p1811_p8 = pneg %p1810_p12 }
  0x4b   : > { %695 = vmatprep.subr.mxu1 %v642_v31  ;;  %935 = vmatprep.subr.mxu0 %v1882_v0  ;;  %v923_v9 = vld [vmem:[#allocation5 + $0xf8] sm:$0xff]  ;;  %v922_v10 = vld [vmem:[#allocation5 + $0xf0] sm:$0xff]  ;;  %v921_v11 = vld [vmem:[#allocation5 + $0xe8] sm:$0xff] }
  0x4c   : > { %1524 = vmatmul.mubr.msk.f32.gmra.mxu0 %vm394_vm1, %v368_v25  ;;  %696 = vmatpush1.msra.mxu1 %v641_v32  ;;  %v920_v12 = vld [vmem:[#allocation5 + $0xe0] sm:$0xff]  ;;  %v919_v13 = vld [vmem:[#allocation5 + $0xd8] sm:$0xff]  ;;  %v918_v14 = vld [vmem:[#allocation5 + $0xd0] sm:$0xff]  ;;  %p1818_p3 = pnand %p1817_p1, %p1811_p8 }
  0x4d   : > { %1526 = vmatprep.mubr.msk.f32.mxu0 %vm1883_vm0, %v1882_v0  ;;  %697 = vmatprep.subr.mxu1 %v640_v33  ;;  %v917_v15 = vld [vmem:[#allocation5 + $0xc8] sm:$0xff]  ;;  %v916_v16 = vld [vmem:[#allocation5 + $0xc0] sm:$0xff]  ;;  %v915_v17 = vld [vmem:[#allocation5 + $0xb8] sm:$0xff] }
  0x4e   : > { %698 = vmatpush1.msra.mxu1 %v639_v34  ;;  %936 = vmatpush1.msra.mxu0 %v905_v58  ;;  %v914_v18 = vld [vmem:[#allocation5 + $0xb0] sm:$0xff]  ;;  %v2238_v19 = vld [vmem:[%s2619_s2] ss:$0 sm:$0xff]  ;;  %v913_v20 = vld [vmem:[#allocation5 + $0xa8] sm:$0xff] }
  0x4f   : > { %699 = vmatprep.subr.mxu1 %v638_v36  ;;  %937 = vmatprep.subr.mxu0 %v1882_v0  ;;  %v912_v23 = vld [vmem:[#allocation5 + $0xa0] sm:$0xff]  ;;  %v911_v26 = vld [vmem:[#allocation5 + $0x98] sm:$0xff] }
  0x50   : > { %1527 = vmatmul.mubr.msk.f32.gmra.mxu0 %vm394_vm1, %v369_v30  ;;  %700 = vmatpush1.msra.mxu1 %v637_v37 }
  0x51   : > { %1529 = vmatprep.mubr.msk.f32.mxu0 %vm1883_vm0, %v1882_v0  ;;  %701 = vmatprep.subr.mxu1 %v636_v38 }
  0x52   : > { %702 = vmatpush1.msra.mxu1 %v635_v49  ;;  %938 = vmatpush1.msra.mxu0 %v904_v59 }
  0x53   : > { %703 = vmatprep.subr.mxu1 %v634_v50  ;;  %939 = vmatprep.subr.mxu0 %v1882_v0 }
  0x54   : > { %1530 = vmatmul.mubr.msk.f32.gmra.mxu0 %vm394_vm1, %v370_v35  ;;  %704 = vmatpush1.msra.mxu1 %v633_v52 }
  0x55   : > { %1532 = vmatprep.mubr.msk.f32.mxu0 %vm1883_vm0, %v1882_v0  ;;  %705 = vmatprep.subr.mxu1 %v632_v53 }
  0x56   : > { %706 = vmatpush1.msra.mxu1 %v631_v54  ;;  %940 = vmatpush1.msra.mxu0 %v903_v60 }
  0x57   : > { %1657 = vmatprep.subr.mxu1 %v1882_v0  ;;  %941 = vmatprep.subr.mxu0 %v1882_v0 }
  0x58   : > { %1533 = vmatmul.mubr.msk.f32.gmra.mxu0 %vm394_vm1, %v371_v39 }
  0x59   : > { %1535 = vmatprep.mubr.msk.f32.mxu0 %vm1883_vm0, %v1882_v0  ;;  %942 = vmatpush1.msra.mxu0 %v902_v61 }
  0x5a   : > { %943 = vmatprep.subr.mxu0 %v1882_v0 }
  0x5b   : > { %944 = vmatpush1.msra.mxu0 %v901_v62 }
  0x5c   : > { %1536 = vmatmul.mubr.msk.f32.gmra.mxu0 %vm394_vm1, %v372_v40  ;;  %945 = vmatprep.subr.mxu0 %v1882_v0 }
  0x5d   : > { %1538 = vmatprep.mubr.msk.f32.mxu0 %vm1883_vm0, %v1882_v0  ;;  %946 = vmatpush1.msra.mxu0 %v900_v63 }
  0x5e   : > { %947 = vmatprep.subr.mxu0 %v1882_v0 }
  0x5f   : > { %948 = vmatpush1.msra.mxu0 %v899_v1 }
  0x60   : > { %1539 = vmatmul.mubr.msk.f32.gmra.mxu0 %vm394_vm1, %v373_v41  ;;  %949 = vmatprep.subr.mxu0 %v1882_v0 }
  0x61   : > { %1541 = vmatprep.mubr.msk.f32.mxu0 %vm1883_vm0, %v1882_v0  ;;  %950 = vmatpush1.msra.mxu0 %v898_v2 }
  0x62   : > { %951 = vmatprep.subr.mxu0 %v1882_v0 }
  0x63   : > { %952 = vmatpush1.msra.mxu0 %v897_v3 }
  0x64   : > { %1542 = vmatmul.mubr.msk.f32.gmra.mxu0 %vm394_vm1, %v374_v42  ;;  %953 = vmatprep.subr.mxu0 %v1882_v0 }
  0x65   : > { %1544 = vmatprep.mubr.msk.f32.mxu0 %vm1883_vm0, %v1882_v0  ;;  %954 = vmatpush1.msra.mxu0 %v896_v4 }
  0x66   : > { %955 = vmatprep.subr.mxu0 %v1882_v0 }
  0x67   : > { %956 = vmatpush1.msra.mxu0 %v895_v5 }
  0x68   : > { %1545 = vmatmul.mubr.msk.f32.gmra.mxu0 %vm394_vm1, %v375_v43  ;;  %957 = vmatprep.subr.mxu0 %v1882_v0 }
  0x69   : > { %1547 = vmatprep.mubr.msk.f32.mxu0 %vm1883_vm0, %v1882_v0  ;;  %958 = vmatpush1.msra.mxu0 %v894_v6 }
  0x6a   : > { %959 = vmatprep.subr.mxu0 %v1882_v0 }
  0x6b   : > { %960 = vmatpush1.msra.mxu0 %v893_v7 }
  0x6c   : > { %1548 = vmatmul.mubr.msk.f32.gmra.mxu0 %vm394_vm1, %v376_v44  ;;  %961 = vmatprep.subr.mxu0 %v1882_v0 }
  0x6d   : > { %1550 = vmatprep.mubr.msk.f32.mxu0 %vm1883_vm0, %v1882_v0  ;;  %962 = vmatpush1.msra.mxu0 %v892_v8 }
  0x6e   : > { %963 = vmatprep.subr.mxu0 %v1882_v0 }
  0x6f   : > { %964 = vmatpush2.msra.mxu0 %v923_v9 }
  0x70   : > { %1551 = vmatmul.mubr.msk.f32.gmra.mxu0 %vm394_vm1, %v377_v45  ;;  %965 = vmatprep.subr.mxu0 %v1882_v0 }
  0x71   : > { %1553 = vmatprep.mubr.msk.f32.mxu0 %vm1883_vm0, %v1882_v0  ;;  %966 = vmatpush2.msra.mxu0 %v922_v10 }
  0x72   : > { %967 = vmatprep.subr.mxu0 %v1882_v0 }
  0x73   : > { %968 = vmatpush2.msra.mxu0 %v921_v11 }
  0x74   : > { %1554 = vmatmul.mubr.msk.f32.gmra.mxu0 %vm394_vm1, %v378_v46  ;;  %969 = vmatprep.subr.mxu0 %v1882_v0 }
  0x75   : > { %1556 = vmatprep.mubr.msk.f32.mxu0 %vm1883_vm0, %v1882_v0  ;;  %970 = vmatpush2.msra.mxu0 %v920_v12 }
  0x76   : > { %971 = vmatprep.subr.mxu0 %v1882_v0 }
  0x77   : > { %972 = vmatpush2.msra.mxu0 %v919_v13 }
  0x78   : > { %1557 = vmatmul.mubr.msk.f32.gmra.mxu0 %vm394_vm1, %v379_v47  ;;  %973 = vmatprep.subr.mxu0 %v1882_v0 }
  0x79   : > { %1559 = vmatprep.mubr.msk.f32.mxu0 %vm1883_vm0, %v1882_v0  ;;  %974 = vmatpush2.msra.mxu0 %v918_v14 }
  0x7a   : > { %975 = vmatprep.subr.mxu0 %v1882_v0 }
  0x7b   : > { %976 = vmatpush2.msra.mxu0 %v917_v15 }
  0x7c   : > { %1560 = vmatmul.mubr.msk.f32.gmra.mxu0 %vm394_vm1, %v380_v48  ;;  %977 = vmatprep.subr.mxu0 %v1882_v0 }
  0x7d   : > { %1562 = vmatprep.mubr.msk.f32.mxu0 %vm1883_vm0, %v1882_v0  ;;  %978 = vmatpush2.msra.mxu0 %v916_v16 }
  0x7e   : > { %979 = vmatprep.subr.mxu0 %v1882_v0 }
  0x7f   : > { %980 = vmatpush2.msra.mxu0 %v915_v17 }
  0x80   : > { %1563 = vmatmul.mubr.msk.f32.gmra.mxu0 %vm394_vm1, %v381_v51  ;;  %981 = vmatprep.subr.mxu0 %v1882_v0 }
  0x81   : > { %1565 = vmatprep.mubr.msk.f32.mxu0 %vm1883_vm0, %v1882_v0  ;;  %982 = vmatpush2.msra.mxu0 %v914_v18 }
  0x82   : > { %983 = vmatprep.subr.mxu0 %v1882_v0 }
  0x83   : > { %984 = vmatpush2.msra.mxu0 %v913_v20 }
  0x84   : > { %1566 = vmatmul.mubr.msk.f32.gmra.mxu0 %vm394_vm1, %v382_v55  ;;  %985 = vmatprep.subr.mxu0 %v1882_v0 }
  0x85   : > { %986 = vmatpush2.msra.mxu0 %v912_v23 }
  0x86   : > { %987 = vmatprep.subr.mxu0 %v1882_v0 }
  0x87   : > { %988 = vmatpush2.msra.mxu0 %v911_v26 }
  0x88   : > { %989 = vmatprep.subr.mxu0 %v1882_v0 }
  0xfc   : > { %v518_v21 = vpop.f32.mrf.mxu0 }
  0xfd   : > { %v519_v22 = vadd.f32 %v2238_v19, %v518_v21 }
  0xfe   : > { %v1513_v24 = vpop.f32.mrf.mxu0 }
  0xff   : > { %v612_v25 = vmax.f32 %v519_v22, 0.0 }
 0x100   : > { %v523_v27 = vpop.f32.mrf.mxu0 }
 0x101   : > { %v524_v28 = vadd.f32 %v2238_v19, %v523_v27  ;;  %740 = vmatmul.mubr.f32.vlgmr.msra.gmra.mxu1 %v612_v25 }
 0x102   : > { %v1516_v29 = vpop.f32.mrf.mxu0  ;;  %745 = vmatprep.mubr.f32.mxu1 %v1882_v0 }
 0x103   : > { %v613_v30 = vmax.f32 %v524_v28, 0.0 }
 0x104   : > { %v528_v31 = vpop.f32.mrf.mxu0 }
 0x105   : > { %v529_v32 = vadd.f32 %v2238_v19, %v528_v31  ;;  %746 = vmatmul.mubr.f32.gmra.mxu1 %v613_v30 }
 0x106   : > { %v1519_v33 = vpop.f32.mrf.mxu0  ;;  %751 = vmatprep.mubr.f32.mxu1 %v1882_v0 }
 0x107   : > { %v614_v34 = vmax.f32 %v529_v32, 0.0  ;;  %v910_v33 = vld [vmem:[#allocation5 + $0x90] sm:$0xff] }
 0x108   : > { %v533_v35 = vpop.f32.mrf.mxu0  ;;  %990 = vmatpush2.msra.mxu0 %v910_v33 }
 0x109   : > { %v534_v36 = vadd.f32 %v2238_v19, %v533_v35  ;;  %752 = vmatmul.mubr.f32.gmra.mxu1 %v614_v34  ;;  %991 = vmatprep.subr.mxu0 %v1882_v0 }
 0x10a   : > { %v1522_v37 = vpop.f32.mrf.mxu0  ;;  %757 = vmatprep.mubr.f32.mxu1 %v1882_v0 }
 0x10b   : > { %v615_v38 = vmax.f32 %v534_v36, 0.0  ;;  %v909_v36 = vld [vmem:[#allocation5 + $0x88] sm:$0xff] }
 0x10c   : > { %v538_v39 = vpop.f32.mrf.mxu0  ;;  %992 = vmatpush2.msra.mxu0 %v909_v36 }
 0x10d   : > { %v539_v40 = vadd.f32 %v2238_v19, %v538_v39  ;;  %758 = vmatmul.mubr.f32.gmra.mxu1 %v615_v38  ;;  %993 = vmatprep.subr.mxu0 %v1882_v0  ;;  %v908_v39 = vld [vmem:[#allocation5 + $0x80] sm:$0xff] }
 0x10e   : > { %v1525_v41 = vpop.f32.mrf.mxu0  ;;  %763 = vmatprep.mubr.f32.mxu1 %v1882_v0  ;;  %994 = vmatpush2.msra.mxu0 %v908_v39 }
 0x10f   : > { %v616_v42 = vmax.f32 %v539_v40, 0.0  ;;  %1568 = vmatprep.subr.mxu0 %v1882_v0  ;;  %v2294_v40 = vld [vmem:[%s2624_s7 + $0x70] sm:$0xff]  ;;  %v2301_v41 = vld [vmem:[%s2624_s7 + $0x68] sm:$0xff] }
 0x110   : > { %v543_v43 = vpop.f32.mrf.mxu0 }
 0x111   : > { %v544_v44 = vadd.f32 %v2238_v19, %v543_v43  ;;  %764 = vmatmul.mubr.f32.gmra.mxu1 %v616_v42  ;;  %v2308_v42 = vld [vmem:[%s2624_s7 + $0x60] sm:$0xff]  ;;  %v2315_v43 = vld [vmem:[%s2624_s7 + $0x58] sm:$0xff] }
 0x112   : > { %v1528_v45 = vpop.f32.mrf.mxu0  ;;  %769 = vmatprep.mubr.f32.mxu1 %v1882_v0 }
 0x113   : > { %v617_v46 = vmax.f32 %v544_v44, 0.0  ;;  %v2322_v44 = vld [vmem:[%s2624_s7 + $0x50] sm:$0xff]  ;;  %v2329_v45 = vld [vmem:[%s2624_s7 + $0x48] sm:$0xff] }
 0x114   : > { %v548_v47 = vpop.f32.mrf.mxu0 }
 0x115   : > { %v549_v48 = vadd.f32 %v2238_v19, %v548_v47  ;;  %770 = vmatmul.mubr.f32.gmra.mxu1 %v617_v46  ;;  %v2336_v46 = vld [vmem:[%s2624_s7 + $0x40] sm:$0xff]  ;;  %v2343_v47 = vld [vmem:[%s2624_s7 + $0x38] sm:$0xff] }
 0x116   : > { %v1531_v49 = vpop.f32.mrf.mxu0  ;;  %775 = vmatprep.mubr.f32.mxu1 %v1882_v0 }
 0x117   : > { %v618_v50 = vmax.f32 %v549_v48, 0.0  ;;  %v2350_v48 = vld [vmem:[%s2624_s7 + $0x30] sm:$0xff]  ;;  %v2357_v49 = vld [vmem:[%s2624_s7 + $0x28] sm:$0xff] }
 0x118   : > { %v553_v51 = vpop.f32.mrf.mxu0 }
 0x119   : > { %v554_v52 = vadd.f32 %v2238_v19, %v553_v51  ;;  %776 = vmatmul.mubr.f32.gmra.mxu1 %v618_v50  ;;  %v2364_v50 = vld [vmem:[%s2624_s7 + $0x20] sm:$0xff]  ;;  %v2371_v51 = vld [vmem:[%s2624_s7 + $0x18] sm:$0xff] }
 0x11a   : > { %v1534_v53 = vpop.f32.mrf.mxu0  ;;  %781 = vmatprep.mubr.f32.mxu1 %v1882_v0 }
 0x11b   : > { %v619_v54 = vmax.f32 %v554_v52, 0.0  ;;  %v665_v52 = vlaneseq }
 0x11c   : > { %v558_v55 = vpop.f32.mrf.mxu0 }
 0x11d   : > { %v559_v56 = vadd.f32 %v2238_v19, %v558_v55  ;;  %782 = vmatmul.mubr.f32.gmra.mxu1 %v619_v54  ;;  %v666_v53 = vshrl.u32 %v665_v52, 7  ;;  %v663_v55 = vld [vmem:[%s2621_s4] sm:$0x3] }
 0x11e   : > { %v1537_v57 = vpop.f32.mrf.mxu0  ;;  %787 = vmatprep.mubr.f32.mxu1 %v1882_v0 }
 0x11f   : > { %v620_v58 = vmax.f32 %v559_v56, 0.0  ;;  %v667_v54 = vsub.s32 0, %v666_v53  ;;  %v671_v56 = vsub.s32 1, %v666_v53 }
 0x120   : > { %v563_v59 = vpop.f32.mrf.mxu0 }
 0x121   : > { %v564_v60 = vadd.f32 %v2238_v19, %v563_v59  ;;  %788 = vmatmul.mubr.f32.gmra.mxu1 %v620_v58  ;;  %v2378_v57 = vrot.slane %v663_v55, %v667_v54  ;;  %v2380_v58 = vrot.slane %v663_v55, %v671_v56 }
 0x122   : > { %v1540_v61 = vpop.f32.mrf.mxu0  ;;  %793 = vmatprep.mubr.f32.mxu1 %v1882_v0 }
 0x123   : > { %v621_v62 = vmax.f32 %v564_v60, 0.0 }
 0x124   : > { %v568_v63 = vpop.f32.mrf.mxu0 }
 0x125   : > { %v569_v1 = vadd.f32 %v2238_v19, %v568_v63  ;;  %794 = vmatmul.mubr.f32.gmra.mxu1 %v621_v62 }
 0x126   : > { %v1543_v2 = vpop.f32.mrf.mxu0  ;;  %799 = vmatprep.mubr.f32.mxu1 %v1882_v0 }
 0x127   : > { %v622_v3 = vmax.f32 %v569_v1, 0.0 }
 0x128   : > { %v573_v4 = vpop.f32.mrf.mxu0 }
 0x129   : > { %v574_v5 = vadd.f32 %v2238_v19, %v573_v4  ;;  %800 = vmatmul.mubr.f32.gmra.mxu1 %v622_v3 }
 0x12a   : > { %v1546_v6 = vpop.f32.mrf.mxu0  ;;  %805 = vmatprep.mubr.f32.mxu1 %v1882_v0 }
 0x12b   : > { %v623_v7 = vmax.f32 %v574_v5, 0.0 }
 0x12c   : > { %v578_v8 = vpop.f32.mrf.mxu0 }
 0x12d   : > { %v579_v9 = vadd.f32 %v2238_v19, %v578_v8  ;;  %806 = vmatmul.mubr.f32.gmra.mxu1 %v623_v7 }
 0x12e   : > { %v1549_v10 = vpop.f32.mrf.mxu0  ;;  %811 = vmatprep.mubr.f32.mxu1 %v1882_v0 }
 0x12f   : > { %v624_v11 = vmax.f32 %v579_v9, 0.0 }
 0x130   : > { %v583_v12 = vpop.f32.mrf.mxu0 }
 0x131   : > { %v584_v13 = vadd.f32 %v2238_v19, %v583_v12  ;;  %812 = vmatmul.mubr.f32.gmra.mxu1 %v624_v11 }
 0x132   : > { %v1552_v14 = vpop.f32.mrf.mxu0  ;;  %817 = vmatprep.mubr.f32.mxu1 %v1882_v0 }
 0x133   : > { %v625_v15 = vmax.f32 %v584_v13, 0.0 }
 0x134   : > { %v588_v16 = vpop.f32.mrf.mxu0 }
 0x135   : > { %v589_v17 = vadd.f32 %v2238_v19, %v588_v16  ;;  %818 = vmatmul.mubr.f32.gmra.mxu1 %v625_v15 }
 0x136   : > { %v1555_v18 = vpop.f32.mrf.mxu0  ;;  %823 = vmatprep.mubr.f32.mxu1 %v1882_v0 }
 0x137   : > { %v626_v20 = vmax.f32 %v589_v17, 0.0 }
 0x138   : > { %v593_v21 = vpop.f32.mrf.mxu0 }
 0x139   : > { %v594_v22 = vadd.f32 %v2238_v19, %v593_v21  ;;  %824 = vmatmul.mubr.f32.gmra.mxu1 %v626_v20 }
 0x13a   : > { %v1558_v23 = vpop.f32.mrf.mxu0  ;;  %829 = vmatprep.mubr.f32.mxu1 %v1882_v0 }
 0x13b   : > { %v627_v24 = vmax.f32 %v594_v22, 0.0 }
 0x13c   : > { %v598_v25 = vpop.f32.mrf.mxu0 }
 0x13d   : > { %v599_v26 = vadd.f32 %v2238_v19, %v598_v25  ;;  %830 = vmatmul.mubr.f32.gmra.mxu1 %v627_v24 }
 0x13e   : > { %v1561_v27 = vpop.f32.mrf.mxu0  ;;  %835 = vmatprep.mubr.f32.mxu1 %v1882_v0 }
 0x13f   : > { %v628_v28 = vmax.f32 %v599_v26, 0.0 }
 0x140   : > { %v603_v29 = vpop.f32.mrf.mxu0 }
 0x141   : > { %v604_v30 = vadd.f32 %v2238_v19, %v603_v29  ;;  %836 = vmatmul.mubr.f32.gmra.mxu1 %v628_v28 }
 0x142   : > { %v1564_v31 = vpop.f32.mrf.mxu0  ;;  %841 = vmatprep.mubr.f32.mxu1 %v1882_v0 }
 0x143   : > { %v629_v32 = vmax.f32 %v604_v30, 0.0 }
 0x144   : > { %v608_v34 = vpop.f32.mrf.mxu0 }
 0x145   : > { %v609_v35 = vadd.f32 %v2238_v19, %v608_v34  ;;  %842 = vmatmul.mubr.f32.gmra.mxu1 %v629_v32  ;;  %v1125_v19 = vld [vmem:[%s2624_s7 + $0x78] sm:$0xff] }
 0x146   : > { %v1567_v37 = vpop.f32.mrf.mxu0  ;;  %847 = vmatprep.mubr.f32.mxu1 %v1882_v0  ;;  %1673 = vmatpush3.msra.mxu1 %v1125_v19 }
 0x147   : > { %v630_v38 = vmax.f32 %v609_v35, 0.0  ;;  %1658 = vmatprep.subr.mxu1 %v1882_v0 }
 0x148   : > { %1674 = vmatpush3.msra.mxu1 %v2294_v40 }
 0x149   : > { %848 = vmatmul.mubr.f32.gmra.mxu1 %v630_v38  ;;  %1659 = vmatprep.subr.mxu1 %v1882_v0 }
 0x14a   : > { %1609 = vmatprep.mubr.msk.f32.mxu1 %vm1883_vm0, %v1882_v0  ;;  %1675 = vmatpush3.msra.mxu1 %v2301_v41 }
 0x14b   : > { %1660 = vmatprep.subr.mxu1 %v1882_v0 }
 0x14c   : > { %1676 = vmatpush3.msra.mxu1 %v2308_v42 }
 0x14d   : > { %1661 = vmatprep.subr.mxu1 %v1882_v0 }
 0x14e   : > { %1677 = vmatpush3.msra.mxu1 %v2315_v43 }
 0x14f   : > { %1662 = vmatprep.subr.mxu1 %v1882_v0 }
 0x150   : > { %1678 = vmatpush3.msra.mxu1 %v2322_v44 }
 0x151   : > { %1663 = vmatprep.subr.mxu1 %v1882_v0 }
 0x152   : > { %1679 = vmatpush3.msra.mxu1 %v2329_v45 }
 0x153   : > { %1664 = vmatprep.subr.mxu1 %v1882_v0 }
 0x154   : > { %1680 = vmatpush3.msra.mxu1 %v2336_v46 }
 0x155   : > { %1665 = vmatprep.subr.mxu1 %v1882_v0 }
 0x156   : > { %1681 = vmatpush3.msra.mxu1 %v2343_v47 }
 0x157   : > { %1666 = vmatprep.subr.mxu1 %v1882_v0 }
 0x158   : > { %1682 = vmatpush3.msra.mxu1 %v2350_v48 }
 0x159   : > { %1667 = vmatprep.subr.mxu1 %v1882_v0 }
 0x15a   : > { %1683 = vmatpush3.msra.mxu1 %v2357_v49 }
 0x15b   : > { %1668 = vmatprep.subr.mxu1 %v1882_v0 }
 0x15c   : > { %1684 = vmatpush3.msra.mxu1 %v2364_v50 }
 0x15d   : > { %1669 = vmatprep.subr.mxu1 %v1882_v0 }
 0x15e   : > { %1685 = vmatpush3.msra.mxu1 %v2371_v51 }
 0x15f   : > { %1670 = vmatprep.subr.mxu1 %v1882_v0 }
 0x1c1   : > { %v741_v59 = vpop.f32.mrf.mxu1 }
 0x1c2   : > { %v742_v60 = vadd.f32 %v741_v59, %v2378_v57 }
 0x1c3   : > { %v743_v61 = vpop.f32.mrf.mxu1 }
 0x1c4   : > { %v744_v62 = vadd.f32 %v743_v61, %v2380_v58  ;;  %v854_v2 = vmax.f32 %v742_v60, 0.0 }
 0x1c5   : > { %v747_v63 = vpop.f32.mrf.mxu1 }
 0x1c6   : > { %v855_v1 = vmax.f32 %v744_v62, 0.0  ;;  %v748_v3 = vadd.f32 %v747_v63, %v2378_v57 }
 0x1c7   : > { %v749_v4 = vpop.f32.mrf.mxu1 }
 0x1c8   : > { %v750_v5 = vadd.f32 %v749_v4, %v2380_v58  ;;  %995 = vmatprep.mubr.f32.mxu0 %v855_v1  ;;  %v856_v8 = vmax.f32 %v748_v3, 0.0 }
 0x1c9   : > { %v753_v6 = vpop.f32.mrf.mxu1  ;;  %996 = vmatmul.mubr.f32.vlgmr.msra.gmra.mxu0 %v854_v2 }
 0x1ca   : > { %v857_v7 = vmax.f32 %v750_v5, 0.0  ;;  %1569 = vmatpush3.msra.mxu0 %v1125_v19  ;;  %v754_v9 = vadd.f32 %v753_v6, %v2378_v57 }
 0x1cb   : > { %v755_v10 = vpop.f32.mrf.mxu1  ;;  %1570 = vmatprep.subr.mxu0 %v1882_v0 }
 0x1cc   : > { %v756_v11 = vadd.f32 %v755_v10, %v2380_v58  ;;  %1000 = vmatprep.mubr.f32.mxu0 %v857_v7  ;;  %1571 = vmatpush3.msra.mxu0 %v2294_v40  ;;  %v858_v14 = vmax.f32 %v754_v9, 0.0 }
 0x1cd   : > { %v759_v12 = vpop.f32.mrf.mxu1  ;;  %1001 = vmatmul.mubr.f32.gmra.mxu0 %v856_v8  ;;  %1572 = vmatprep.subr.mxu0 %v1882_v0 }
 0x1ce   : > { %v859_v13 = vmax.f32 %v756_v11, 0.0  ;;  %1573 = vmatpush3.msra.mxu0 %v2301_v41  ;;  %v760_v15 = vadd.f32 %v759_v12, %v2378_v57 }
 0x1cf   : > { %v761_v16 = vpop.f32.mrf.mxu1  ;;  %1574 = vmatprep.subr.mxu0 %v1882_v0 }
 0x1d0   : > { %v762_v17 = vadd.f32 %v761_v16, %v2380_v58  ;;  %1005 = vmatprep.mubr.f32.mxu0 %v859_v13  ;;  %1575 = vmatpush3.msra.mxu0 %v2308_v42  ;;  %v860_v21 = vmax.f32 %v760_v15, 0.0 }
 0x1d1   : > { %v765_v18 = vpop.f32.mrf.mxu1  ;;  %1006 = vmatmul.mubr.f32.gmra.mxu0 %v858_v14  ;;  %1576 = vmatprep.subr.mxu0 %v1882_v0 }
 0x1d2   : > { %v861_v20 = vmax.f32 %v762_v17, 0.0  ;;  %1577 = vmatpush3.msra.mxu0 %v2315_v43  ;;  %v766_v22 = vadd.f32 %v765_v18, %v2378_v57 }
 0x1d3   : > { %v767_v23 = vpop.f32.mrf.mxu1  ;;  %1578 = vmatprep.subr.mxu0 %v1882_v0 }
 0x1d4   : > { %v768_v24 = vadd.f32 %v767_v23, %v2380_v58  ;;  %1010 = vmatprep.mubr.f32.mxu0 %v861_v20  ;;  %1579 = vmatpush3.msra.mxu0 %v2322_v44  ;;  %v862_v27 = vmax.f32 %v766_v22, 0.0 }
 0x1d5   : > { %v771_v25 = vpop.f32.mrf.mxu1  ;;  %1011 = vmatmul.mubr.f32.gmra.mxu0 %v860_v21  ;;  %1580 = vmatprep.subr.mxu0 %v1882_v0 }
 0x1d6   : > { %v863_v26 = vmax.f32 %v768_v24, 0.0  ;;  %1581 = vmatpush3.msra.mxu0 %v2329_v45  ;;  %v772_v28 = vadd.f32 %v771_v25, %v2378_v57 }
 0x1d7   : > { %v773_v29 = vpop.f32.mrf.mxu1  ;;  %1582 = vmatprep.subr.mxu0 %v1882_v0 }
 0x1d8   : > { %v774_v30 = vadd.f32 %v773_v29, %v2380_v58  ;;  %1015 = vmatprep.mubr.f32.mxu0 %v863_v26  ;;  %1583 = vmatpush3.msra.mxu0 %v2336_v46  ;;  %v864_v33 = vmax.f32 %v772_v28, 0.0 }
 0x1d9   : > { %v777_v31 = vpop.f32.mrf.mxu1  ;;  %1016 = vmatmul.mubr.f32.gmra.mxu0 %v862_v27  ;;  %1584 = vmatprep.subr.mxu0 %v1882_v0 }
 0x1da   : > { %v865_v32 = vmax.f32 %v774_v30, 0.0  ;;  %1585 = vmatpush3.msra.mxu0 %v2343_v47  ;;  %v778_v34 = vadd.f32 %v777_v31, %v2378_v57 }
 0x1db   : > { %v779_v35 = vpop.f32.mrf.mxu1  ;;  %1586 = vmatprep.subr.mxu0 %v1882_v0 }
 0x1dc   : > { %v780_v36 = vadd.f32 %v779_v35, %v2380_v58  ;;  %1020 = vmatprep.mubr.f32.mxu0 %v865_v32  ;;  %1587 = vmatpush3.msra.mxu0 %v2350_v48  ;;  %v866_v39 = vmax.f32 %v778_v34, 0.0 }
 0x1dd   : > { %v783_v37 = vpop.f32.mrf.mxu1  ;;  %1021 = vmatmul.mubr.f32.gmra.mxu0 %v864_v33  ;;  %1588 = vmatprep.subr.mxu0 %v1882_v0 }
 0x1de   : > { %v867_v38 = vmax.f32 %v780_v36, 0.0  ;;  %1589 = vmatpush3.msra.mxu0 %v2357_v49  ;;  %v784_v19 = vadd.f32 %v783_v37, %v2378_v57 }
 0x1df   : > { %v785_v40 = vpop.f32.mrf.mxu1  ;;  %1590 = vmatprep.subr.mxu0 %v1882_v0 }
 0x1e0   : > { %v786_v41 = vadd.f32 %v785_v40, %v2380_v58  ;;  %1025 = vmatprep.mubr.f32.mxu0 %v867_v38  ;;  %1591 = vmatpush3.msra.mxu0 %v2364_v50  ;;  %v868_v44 = vmax.f32 %v784_v19, 0.0 }
 0x1e1   : > { %v789_v42 = vpop.f32.mrf.mxu1  ;;  %1026 = vmatmul.mubr.f32.gmra.mxu0 %v866_v39  ;;  %1592 = vmatprep.subr.mxu0 %v1882_v0 }
 0x1e2   : > { %v869_v43 = vmax.f32 %v786_v41, 0.0  ;;  %1593 = vmatpush3.msra.mxu0 %v2371_v51  ;;  %v790_v45 = vadd.f32 %v789_v42, %v2378_v57  ;;  %v1112_v41 = vld [vmem:[%s2624_s7 + $0x10] sm:$0xff] }
 0x1e3   : > { %v791_v46 = vpop.f32.mrf.mxu1  ;;  %1594 = vmatprep.subr.mxu0 %v1882_v0  ;;  %1686 = vmatpush3.msra.mxu1 %v1112_v41 }
 0x1e4   : > { %v792_v47 = vadd.f32 %v791_v46, %v2380_v58  ;;  %1030 = vmatprep.mubr.f32.mxu0 %v869_v43  ;;  %v870_v50 = vmax.f32 %v790_v45, 0.0  ;;  %1595 = vmatpush3.msra.mxu0 %v1112_v41 }
 0x1e5   : > { %v795_v48 = vpop.f32.mrf.mxu1  ;;  %1031 = vmatmul.mubr.f32.gmra.mxu0 %v868_v44  ;;  %v1111_v44 = vld [vmem:[%s2624_s7 + $0x8] sm:$0xff]  ;;  %1671 = vmatprep.subr.mxu1 %v1882_v0 }
 0x1e6   : > { %v871_v49 = vmax.f32 %v792_v47, 0.0  ;;  %v796_v52 = vadd.f32 %v795_v48, %v2378_v57  ;;  %1596 = vmatprep.subr.mxu0 %v1882_v0  ;;  %1687 = vmatpush3.msra.mxu1 %v1111_v44 }
 0x1e7   : > { %v797_v53 = vpop.f32.mrf.mxu1  ;;  %1597 = vmatpush3.msra.mxu0 %v1111_v44  ;;  %1672 = vmatprep.subr.mxu1 %v1882_v0 }
 0x1e8   : > { %v798_v54 = vadd.f32 %v797_v53, %v2380_v58  ;;  %1035 = vmatprep.mubr.f32.mxu0 %v871_v49  ;;  %v872_v56 = vmax.f32 %v796_v52, 0.0  ;;  %v1110_v49 = vld [vmem:[%s2624_s7] sm:$0xff]  ;;  %1598 = vmatprep.subr.mxu0 %v1882_v0 }
 0x1e9   : > { %v801_v51 = vpop.f32.mrf.mxu1  ;;  %1036 = vmatmul.mubr.f32.gmra.mxu0 %v870_v50  ;;  %1688 = vmatpush3.msra.mxu1 %v1110_v49 }
 0x1ea   : > { %v873_v55 = vmax.f32 %v798_v54, 0.0  ;;  %v802_v59 = vadd.f32 %v801_v51, %v2378_v57  ;;  %1599 = vmatpush3.msra.mxu0 %v1110_v49 }
 0x1eb   : > { %v803_v60 = vpop.f32.mrf.mxu1 }
 0x1ec   : > { %v804_v61 = vadd.f32 %v803_v60, %v2380_v58  ;;  %1040 = vmatprep.mubr.f32.mxu0 %v873_v55  ;;  %v874_v1 = vmax.f32 %v802_v59, 0.0 }
 0x1ed   : > { %v807_v62 = vpop.f32.mrf.mxu1  ;;  %1041 = vmatmul.mubr.f32.gmra.mxu0 %v872_v56 }
 0x1ee   : > { %v875_v63 = vmax.f32 %v804_v61, 0.0  ;;  %v808_v2 = vadd.f32 %v807_v62, %v2378_v57 }
 0x1ef   : > { %v809_v3 = vpop.f32.mrf.mxu1 }
 0x1f0   : > { %v810_v4 = vadd.f32 %v809_v3, %v2380_v58  ;;  %1045 = vmatprep.mubr.f32.mxu0 %v875_v63  ;;  %v876_v7 = vmax.f32 %v808_v2, 0.0 }
 0x1f1   : > { %v813_v5 = vpop.f32.mrf.mxu1  ;;  %1046 = vmatmul.mubr.f32.gmra.mxu0 %v874_v1 }
 0x1f2   : > { %v877_v6 = vmax.f32 %v810_v4, 0.0  ;;  %v814_v8 = vadd.f32 %v813_v5, %v2378_v57 }
 0x1f3   : > { %v815_v9 = vpop.f32.mrf.mxu1 }
 0x1f4   : > { %v816_v10 = vadd.f32 %v815_v9, %v2380_v58  ;;  %1050 = vmatprep.mubr.f32.mxu0 %v877_v6  ;;  %v878_v13 = vmax.f32 %v814_v8, 0.0 }
 0x1f5   : > { %v819_v11 = vpop.f32.mrf.mxu1  ;;  %1051 = vmatmul.mubr.f32.gmra.mxu0 %v876_v7 }
 0x1f6   : > { %v879_v12 = vmax.f32 %v816_v10, 0.0  ;;  %v820_v14 = vadd.f32 %v819_v11, %v2378_v57 }
 0x1f7   : > { %v821_v15 = vpop.f32.mrf.mxu1 }
 0x1f8   : > { %v822_v16 = vadd.f32 %v821_v15, %v2380_v58  ;;  %1055 = vmatprep.mubr.f32.mxu0 %v879_v12  ;;  %v880_v20 = vmax.f32 %v820_v14, 0.0 }
 0x1f9   : > { %v825_v17 = vpop.f32.mrf.mxu1  ;;  %1056 = vmatmul.mubr.f32.gmra.mxu0 %v878_v13 }
 0x1fa   : > { %v881_v18 = vmax.f32 %v822_v16, 0.0  ;;  %v826_v21 = vadd.f32 %v825_v17, %v2378_v57 }
 0x1fb   : > { %v827_v22 = vpop.f32.mrf.mxu1 }
 0x1fc   : > { %v828_v23 = vadd.f32 %v827_v22, %v2380_v58  ;;  %1060 = vmatprep.mubr.f32.mxu0 %v881_v18  ;;  %v882_v26 = vmax.f32 %v826_v21, 0.0 }
 0x1fd   : > { %v831_v24 = vpop.f32.mrf.mxu1  ;;  %1061 = vmatmul.mubr.f32.gmra.mxu0 %v880_v20 }
 0x1fe   : > { %v883_v25 = vmax.f32 %v828_v23, 0.0  ;;  %v832_v27 = vadd.f32 %v831_v24, %v2378_v57 }
 0x1ff   : > { %v833_v28 = vpop.f32.mrf.mxu1 }
 0x200   : > { %v834_v29 = vadd.f32 %v833_v28, %v2380_v58  ;;  %1065 = vmatprep.mubr.f32.mxu0 %v883_v25  ;;  %v884_v32 = vmax.f32 %v832_v27, 0.0 }
 0x201   : > { %v837_v30 = vpop.f32.mrf.mxu1  ;;  %1066 = vmatmul.mubr.f32.gmra.mxu0 %v882_v26 }
 0x202   : > { %v885_v31 = vmax.f32 %v834_v29, 0.0  ;;  %v838_v33 = vadd.f32 %v837_v30, %v2378_v57 }
 0x203   : > { %v839_v34 = vpop.f32.mrf.mxu1 }
 0x204   : > { %v840_v35 = vadd.f32 %v839_v34, %v2380_v58  ;;  %1070 = vmatprep.mubr.f32.mxu0 %v885_v31  ;;  %v886_v38 = vmax.f32 %v838_v33, 0.0 }
 0x205   : > { %v843_v36 = vpop.f32.mrf.mxu1  ;;  %1071 = vmatmul.mubr.f32.gmra.mxu0 %v884_v32 }
 0x206   : > { %v887_v37 = vmax.f32 %v840_v35, 0.0  ;;  %v844_v39 = vadd.f32 %v843_v36, %v2378_v57 }
 0x207   : > { %v845_v19 = vpop.f32.mrf.mxu1 }
 0x208   : > { %v846_v40 = vadd.f32 %v845_v19, %v2380_v58  ;;  %1075 = vmatprep.mubr.f32.mxu0 %v887_v37  ;;  %v888_v45 = vmax.f32 %v844_v39, 0.0 }
 0x209   : > { %v849_v42 = vpop.f32.mrf.mxu1  ;;  %1076 = vmatmul.mubr.f32.gmra.mxu0 %v886_v38 }
 0x20a   : > { %v889_v43 = vmax.f32 %v846_v40, 0.0  ;;  %v850_v46 = vadd.f32 %v849_v42, %v2378_v57 }
 0x20b   : > { %v851_v47 = vpop.f32.mrf.mxu1 }
 0x20c   : > { %v852_v48 = vadd.f32 %v851_v47, %v2380_v58  ;;  %1080 = vmatprep.mubr.f32.mxu0 %v889_v43  ;;  %v890_v57 = vmax.f32 %v850_v46, 0.0  ;;  %v2463_v58 = vld [vmem:[%s2623_s6] ss:$0 sm:$0xff] }
 0x20d   : > { %1081 = vmatmul.mubr.f32.gmra.mxu0 %v888_v45 }
 0x20e   : > { %v891_v50 = vmax.f32 %v852_v48, 0.0 }
 0x210   : > { %1085 = vmatprep.mubr.f32.mxu0 %v891_v50 }
 0x211   : > { %1086 = vmatmul.mubr.f32.gmra.mxu0 %v890_v57 }
 0x212   : > { %1600 = vmatprep.mubr.msk.f32.mxu0 %vm1883_vm0, %v1882_v0 }
 0x289   : > { %v997_v52 = vpop.f32.mrf.mxu0 }
 0x28a   : > { %v998_v53 = vadd.f32 %v2463_v58, %v997_v52 }
 0x28b   : > { %v999_v54 = vpop.f32.mrf.mxu0 }
 0x28c   : > { %v1091_v51 = vmax.f32 %v998_v53, 0.0 }
 0x28d   : > { %v1002_v55 = vpop.f32.mrf.mxu0 }
 0x28e   : > { %v1003_v56 = vadd.f32 %v2463_v58, %v1002_v55  ;;  %1601 = vmatmul.mubr.f32.vlgmr.msra.gmra.mxu0 %v1091_v51 }
 0x28f   : > { %v1004_v59 = vpop.f32.mrf.mxu0  ;;  %1603 = vmatprep.mubr.msk.f32.mxu0 %vm1883_vm0, %v1882_v0 }
 0x290   : > { %v1092_v60 = vmax.f32 %v1003_v56, 0.0 }
 0x291   : > { %v1007_v61 = vpop.f32.mrf.mxu0 }
 0x292   : > { %v1008_v62 = vadd.f32 %v2463_v58, %v1007_v61  ;;  %1604 = vmatmul.mubr.f32.gmra.mxu0 %v1092_v60 }
 0x293   : > { %v1009_v63 = vpop.f32.mrf.mxu0  ;;  %1606 = vmatprep.mubr.msk.f32.mxu0 %vm1883_vm0, %v1882_v0 }
 0x294   : > { %v1093_v1 = vmax.f32 %v1008_v62, 0.0 }
 0x295   : > { %v1012_v2 = vpop.f32.mrf.mxu0 }
 0x296   : > { %v1013_v3 = vadd.f32 %v2463_v58, %v1012_v2  ;;  %1607 = vmatmul.mubr.f32.gmra.mxu0 %v1093_v1 }
 0x297   : > { %v1014_v4 = vpop.f32.mrf.mxu0 }
 0x298   : > { %v1094_v5 = vmax.f32 %v1013_v3, 0.0  ;;  %v2524_v4 = vld [vmem:[%s2625_s8] ss:$0 sm:$0xff] }
 0x299   : > { %v1017_v6 = vpop.f32.mrf.mxu0 }
 0x29a   : > { %v1018_v7 = vadd.f32 %v2463_v58, %v1017_v6  ;;  %1610 = vmatmul.mubr.f32.vlgmr.msra.gmra.mxu1 %v1094_v5 }
 0x29b   : > { %v1019_v8 = vpop.f32.mrf.mxu0  ;;  %1612 = vmatprep.mubr.msk.f32.mxu1 %vm1883_vm0, %v1882_v0 }
 0x29c   : > { %v1095_v9 = vmax.f32 %v1018_v7, 0.0 }
 0x29d   : > { %v1022_v10 = vpop.f32.mrf.mxu0 }
 0x29e   : > { %v1023_v11 = vadd.f32 %v2463_v58, %v1022_v10  ;;  %1613 = vmatmul.mubr.f32.gmra.mxu1 %v1095_v9 }
 0x29f   : > { %v1024_v12 = vpop.f32.mrf.mxu0  ;;  %1615 = vmatprep.mubr.msk.f32.mxu1 %vm1883_vm0, %v1882_v0 }
 0x2a0   : > { %v1096_v13 = vmax.f32 %v1023_v11, 0.0 }
 0x2a1   : > { %v1027_v14 = vpop.f32.mrf.mxu0 }
 0x2a2   : > { %v1028_v15 = vadd.f32 %v2463_v58, %v1027_v14  ;;  %1616 = vmatmul.mubr.f32.gmra.mxu1 %v1096_v13 }
 0x2a3   : > { %v1029_v16 = vpop.f32.mrf.mxu0  ;;  %1618 = vmatprep.mubr.msk.f32.mxu1 %vm1883_vm0, %v1882_v0 }
 0x2a4   : > { %v1097_v17 = vmax.f32 %v1028_v15, 0.0 }
 0x2a5   : > { %v1032_v18 = vpop.f32.mrf.mxu0 }
 0x2a6   : > { %v1033_v20 = vadd.f32 %v2463_v58, %v1032_v18  ;;  %1619 = vmatmul.mubr.f32.gmra.mxu1 %v1097_v17 }
 0x2a7   : > { %v1034_v21 = vpop.f32.mrf.mxu0  ;;  %1621 = vmatprep.mubr.msk.f32.mxu1 %vm1883_vm0, %v1882_v0 }
 0x2a8   : > { %v1098_v22 = vmax.f32 %v1033_v20, 0.0 }
 0x2a9   : > { %v1037_v23 = vpop.f32.mrf.mxu0 }
 0x2aa   : > { %v1038_v24 = vadd.f32 %v2463_v58, %v1037_v23  ;;  %1622 = vmatmul.mubr.f32.gmra.mxu1 %v1098_v22 }
 0x2ab   : > { %v1039_v25 = vpop.f32.mrf.mxu0  ;;  %1624 = vmatprep.mubr.msk.f32.mxu1 %vm1883_vm0, %v1882_v0 }
 0x2ac   : > { %v1099_v26 = vmax.f32 %v1038_v24, 0.0 }
 0x2ad   : > { %v1042_v27 = vpop.f32.mrf.mxu0 }
 0x2ae   : > { %v1043_v28 = vadd.f32 %v2463_v58, %v1042_v27  ;;  %1625 = vmatmul.mubr.f32.gmra.mxu1 %v1099_v26 }
 0x2af   : > { %v1044_v29 = vpop.f32.mrf.mxu0  ;;  %1627 = vmatprep.mubr.msk.f32.mxu1 %vm1883_vm0, %v1882_v0 }
 0x2b0   : > { %v1100_v30 = vmax.f32 %v1043_v28, 0.0 }
 0x2b1   : > { %v1047_v31 = vpop.f32.mrf.mxu0 }
 0x2b2   : > { %v1048_v32 = vadd.f32 %v2463_v58, %v1047_v31  ;;  %1628 = vmatmul.mubr.f32.gmra.mxu1 %v1100_v30 }
 0x2b3   : > { %v1049_v33 = vpop.f32.mrf.mxu0  ;;  %1630 = vmatprep.mubr.msk.f32.mxu1 %vm1883_vm0, %v1882_v0 }
 0x2b4   : > { %v1101_v34 = vmax.f32 %v1048_v32, 0.0 }
 0x2b5   : > { %v1052_v35 = vpop.f32.mrf.mxu0 }
 0x2b6   : > { %v1053_v36 = vadd.f32 %v2463_v58, %v1052_v35  ;;  %1631 = vmatmul.mubr.f32.gmra.mxu1 %v1101_v34 }
 0x2b7   : > { %v1054_v37 = vpop.f32.mrf.mxu0  ;;  %1633 = vmatprep.mubr.msk.f32.mxu1 %vm1883_vm0, %v1882_v0 }
 0x2b8   : > { %v1102_v38 = vmax.f32 %v1053_v36, 0.0 }
 0x2b9   : > { %v1057_v39 = vpop.f32.mrf.mxu0 }
 0x2ba   : > { %v1058_v19 = vadd.f32 %v2463_v58, %v1057_v39  ;;  %1634 = vmatmul.mubr.f32.gmra.mxu1 %v1102_v38 }
 0x2bb   : > { %v1059_v40 = vpop.f32.mrf.mxu0  ;;  %1636 = vmatprep.mubr.msk.f32.mxu1 %vm1883_vm0, %v1882_v0 }
 0x2bc   : > { %v1103_v41 = vmax.f32 %v1058_v19, 0.0 }
 0x2bd   : > { %v1062_v42 = vpop.f32.mrf.mxu0 }
 0x2be   : > { %v1063_v43 = vadd.f32 %v2463_v58, %v1062_v42  ;;  %1637 = vmatmul.mubr.f32.gmra.mxu1 %v1103_v41 }
 0x2bf   : > { %v1064_v44 = vpop.f32.mrf.mxu0  ;;  %1639 = vmatprep.mubr.msk.f32.mxu1 %vm1883_vm0, %v1882_v0 }
 0x2c0   : > { %v1104_v45 = vmax.f32 %v1063_v43, 0.0 }
 0x2c1   : > { %v1067_v46 = vpop.f32.mrf.mxu0 }
 0x2c2   : > { %v1068_v47 = vadd.f32 %v2463_v58, %v1067_v46  ;;  %1640 = vmatmul.mubr.f32.gmra.mxu1 %v1104_v45 }
 0x2c3   : > { %v1069_v48 = vpop.f32.mrf.mxu0  ;;  %1642 = vmatprep.mubr.msk.f32.mxu1 %vm1883_vm0, %v1882_v0 }
 0x2c4   : > { %v1105_v49 = vmax.f32 %v1068_v47, 0.0 }
 0x2c5   : > { %v1072_v50 = vpop.f32.mrf.mxu0 }
 0x2c6   : > { %v1073_v57 = vadd.f32 %v2463_v58, %v1072_v50  ;;  %1643 = vmatmul.mubr.f32.gmra.mxu1 %v1105_v49 }
 0x2c7   : > { %v1074_v52 = vpop.f32.mrf.mxu0  ;;  %1645 = vmatprep.mubr.msk.f32.mxu1 %vm1883_vm0, %v1882_v0 }
 0x2c8   : > { %v1106_v53 = vmax.f32 %v1073_v57, 0.0 }
 0x2c9   : > { %v1077_v54 = vpop.f32.mrf.mxu0 }
 0x2ca   : > { %v1078_v51 = vadd.f32 %v2463_v58, %v1077_v54  ;;  %1646 = vmatmul.mubr.f32.gmra.mxu1 %v1106_v53 }
 0x2cb   : > { %v1079_v55 = vpop.f32.mrf.mxu0  ;;  %1648 = vmatprep.mubr.msk.f32.mxu1 %vm1883_vm0, %v1882_v0 }
 0x2cc   : > { %v1107_v56 = vmax.f32 %v1078_v51, 0.0 }
 0x2cd   : > { %v1082_v59 = vpop.f32.mrf.mxu0 }
 0x2ce   : > { %v1083_v60 = vadd.f32 %v2463_v58, %v1082_v59  ;;  %1649 = vmatmul.mubr.f32.gmra.mxu1 %v1107_v56 }
 0x2cf   : > { %v1084_v61 = vpop.f32.mrf.mxu0  ;;  %1651 = vmatprep.mubr.msk.f32.mxu1 %vm1883_vm0, %v1882_v0 }
 0x2d0   : > { %v1108_v62 = vmax.f32 %v1083_v60, 0.0 }
 0x2d1   : > { %v1087_v63 = vpop.f32.mrf.mxu0 }
 0x2d2   : > { %v1088_v1 = vadd.f32 %v2463_v58, %v1087_v63  ;;  %1652 = vmatmul.mubr.f32.gmra.mxu1 %v1108_v62 }
 0x2d3   : > { %v1089_v2 = vpop.f32.mrf.mxu0  ;;  %1654 = vmatprep.mubr.msk.f32.mxu1 %vm1883_vm0, %v1882_v0 }
 0x2d4   : > { %v1109_v3 = vmax.f32 %v1088_v1, 0.0 }
 0x2d6   : > { %1655 = vmatmul.mubr.f32.gmra.mxu1 %v1109_v3 }
 0x34e   : > { %v1199_v5 = vpop.f32.mrf.mxu0 }
 0x34f   : > { %v1200_v6 = vadd.f32 %v2524_v4, %v1199_v5 }
 0x350   : > { %v1602_v7 = vpop.f32.mrf.mxu0 }
 0x351   : > { %1293 = vst [vmem:[%s2527_s16] sm:$0xff] %v1200_v6 }
 0x352   : > { %v1204_v0 = vpop.f32.mrf.mxu0 }
 0x353   : > { %v1205_v58 = vadd.f32 %v2524_v4, %v1204_v0 }
 0x354   : > { %v1605_v8 = vpop.f32.mrf.mxu0 }
 0x355   : > { %1294 = vst [vmem:[%s2527_s16 + $0x8] sm:$0xff] %v1205_v58 }
 0x356   : > { %v1209_v9 = vpop.f32.mrf.mxu0 }
 0x357   : > { %v1210_v10 = vadd.f32 %v2524_v4, %v1209_v9 }
 0x358   : > { %v1608_v11 = vpop.f32.mrf.mxu0 }
 0x359   : > { %1295 = vst [vmem:[%s2527_s16 + $0x10] sm:$0xff] %v1210_v10 }
 0x35a   : > { %v1214_v12 = vpop.f32.mrf.mxu1 }
 0x35b   : > { %v1215_v13 = vadd.f32 %v2524_v4, %v1214_v12 }
 0x35c   : > { %v1611_v14 = vpop.f32.mrf.mxu1 }
 0x35d   : > { %1296 = vst [vmem:[%s2527_s16 + $0x18] sm:$0xff] %v1215_v13 }
 0x35e   : > { %v1219_v15 = vpop.f32.mrf.mxu1 }
 0x35f   : > { %v1220_v16 = vadd.f32 %v2524_v4, %v1219_v15 }
 0x360   : > { %v1614_v17 = vpop.f32.mrf.mxu1 }
 0x361   : > { %1297 = vst [vmem:[%s2527_s16 + $0x20] sm:$0xff] %v1220_v16 }
 0x362   : > { %v1224_v18 = vpop.f32.mrf.mxu1 }
 0x363   : > { %v1225_v20 = vadd.f32 %v2524_v4, %v1224_v18 }
 0x364   : > { %v1617_v21 = vpop.f32.mrf.mxu1 }
 0x365   : > { %1298 = vst [vmem:[%s2527_s16 + $0x28] sm:$0xff] %v1225_v20 }
 0x366   : > { %v1229_v22 = vpop.f32.mrf.mxu1 }
 0x367   : > { %v1230_v23 = vadd.f32 %v2524_v4, %v1229_v22 }
 0x368   : > { %v1620_v24 = vpop.f32.mrf.mxu1 }
 0x369   : > { %1299 = vst [vmem:[%s2527_s16 + $0x30] sm:$0xff] %v1230_v23 }
 0x36a   : > { %v1234_v25 = vpop.f32.mrf.mxu1 }
 0x36b   : > { %v1235_v26 = vadd.f32 %v2524_v4, %v1234_v25 }
 0x36c   : > { %v1623_v27 = vpop.f32.mrf.mxu1 }
 0x36d   : > { %1300 = vst [vmem:[%s2527_s16 + $0x38] sm:$0xff] %v1235_v26 }
 0x36e   : > { %v1239_v28 = vpop.f32.mrf.mxu1 }
 0x36f   : > { %v1240_v29 = vadd.f32 %v2524_v4, %v1239_v28 }
 0x370   : > { %v1626_v30 = vpop.f32.mrf.mxu1 }
 0x371   : > { %1301 = vst [vmem:[%s2527_s16 + $0x40] sm:$0xff] %v1240_v29 }
 0x372   : > { %v1244_v31 = vpop.f32.mrf.mxu1 }
 0x373   : > { %v1245_v32 = vadd.f32 %v2524_v4, %v1244_v31 }
 0x374   : > { %v1629_v33 = vpop.f32.mrf.mxu1 }
 0x375   : > { %1302 = vst [vmem:[%s2527_s16 + $0x48] sm:$0xff] %v1245_v32 }
 0x376   : > { %v1249_v34 = vpop.f32.mrf.mxu1 }
 0x377   : > { %v1250_v35 = vadd.f32 %v2524_v4, %v1249_v34 }
 0x378   : > { %v1632_v36 = vpop.f32.mrf.mxu1 }
 0x379   : > { %1303 = vst [vmem:[%s2527_s16 + $0x50] sm:$0xff] %v1250_v35 }
 0x37a   : > { %v1254_v37 = vpop.f32.mrf.mxu1 }
 0x37b   : > { %v1255_v38 = vadd.f32 %v2524_v4, %v1254_v37 }
 0x37c   : > { %v1635_v39 = vpop.f32.mrf.mxu1 }
 0x37d   : > { %1304 = vst [vmem:[%s2527_s16 + $0x58] sm:$0xff] %v1255_v38 }
 0x37e   : > { %v1259_v19 = vpop.f32.mrf.mxu1 }
 0x37f   : > { %v1260_v40 = vadd.f32 %v2524_v4, %v1259_v19 }
 0x380   : > { %v1638_v41 = vpop.f32.mrf.mxu1 }
 0x381   : > { %1305 = vst [vmem:[%s2527_s16 + $0x60] sm:$0xff] %v1260_v40 }
 0x382   : > { %v1264_v42 = vpop.f32.mrf.mxu1 }
 0x383   : > { %v1265_v43 = vadd.f32 %v2524_v4, %v1264_v42 }
 0x384   : > { %v1641_v44 = vpop.f32.mrf.mxu1 }
 0x385   : > { %1306 = vst [vmem:[%s2527_s16 + $0x68] sm:$0xff] %v1265_v43 }
 0x386   : > { %v1269_v45 = vpop.f32.mrf.mxu1 }
 0x387   : > { %v1270_v46 = vadd.f32 %v2524_v4, %v1269_v45 }
 0x388   : > { %v1644_v47 = vpop.f32.mrf.mxu1 }
 0x389   : > { %1307 = vst [vmem:[%s2527_s16 + $0x70] sm:$0xff] %v1270_v46 }
 0x38a   : > { %v1274_v48 = vpop.f32.mrf.mxu1 }
 0x38b   : > { %v1275_v49 = vadd.f32 %v2524_v4, %v1274_v48 }
 0x38c   : > { %v1647_v50 = vpop.f32.mrf.mxu1 }
 0x38d   : > { %1308 = vst [vmem:[%s2527_s16 + $0x78] sm:$0xff] %v1275_v49 }
 0x38e   : > { %v1279_v57 = vpop.f32.mrf.mxu1 }
 0x38f   : > { %v1280_v52 = vadd.f32 %v2524_v4, %v1279_v57 }
 0x390   : > { %v1650_v53 = vpop.f32.mrf.mxu1 }
 0x391   : > { %1309 = vst [vmem:[%s2527_s16 + $0x80] sm:$0xff] %v1280_v52 }
 0x392   : > { %v1284_v54 = vpop.f32.mrf.mxu1 }
 0x393   : > { %v1285_v51 = vadd.f32 %v2524_v4, %v1284_v54 }
 0x394   : > { %v1653_v55 = vpop.f32.mrf.mxu1 }
 0x395   : > { %1310 = vst [vmem:[%s2527_s16 + $0x88] sm:$0xff] %v1285_v51 }
 0x396   : > { %v1289_v56 = vpop.f32.mrf.mxu1 }
 0x397   : > { %v1290_v59 = vadd.f32 %v2524_v4, %v1289_v56 }
 0x398   : > { %v1656_v60 = vpop.f32.mrf.mxu1 }
 0x399   : > { %1311 = vst [vmem:[%s2527_s16 + $0x90] sm:$0xff] %v1290_v59 }
 0x39a   : > { %1821 = shalt.err (!%p1818_p3)
}
 0x39b   : > { %s1822_s26 = scalar_lea.hbm %s2569_s21, 2432  ;;  %s1826_s17 = scalar_lea.hbm %s2626_s9, 4864 }
 0x39c   : > { %p1823_p2 = scmp.ne.s32.totalorder %s2569_s21, %s1822_s26  ;;  %p1827_p7 = scmp.lt.s32.totalorder %s2569_s21, %s2626_s9 }
 0x39d   : > { %p1828_p6 = scmp.lt.s32.totalorder %s1826_s17, %s1822_s26 }
 0x39e   : > { %p1824_p4 = pnand %p1823_p2, %p1975_p5 }
 0x39f   : > { %p1829_p9 = por %p1828_p6, %p1827_p7 }
 0x3a0   : > { %p1825_p13 = pneg %p1824_p4 }
 0x3a2   : > { %p1830_p10 = pnand %p1829_p9, %p1825_p13 }
 0x3a4   : > { %1833 = shalt.err (!%p1830_p10)
}
 0x3a5   : > { %s1885_s27 = smov 128   ;;  %s1886_s24 = smov 8  }
 0x3a6   : > { %1698 = dma.vmem_to_hbm [thread:$0]  (%p1975_p5), %s2571_s22, 2432, %s2569_s21, %s2577_s13, %s1885_s27, %s1885_s27, %s1886_s24  }
 0x3a7 PF: > { %p1715_p12 = scmp.ge.s32.totalorder %s1876_s12, 2  ;;  %s1341_s28 = sand.u32 1, %s1864_s30  }
 0x3a8   : > { %p2636_p8 = scmp.ne.s32.totalorder %s2629_s20, 0  ;;  %s1342_s29 = scalar_lea.sflag [#allocation4], %s1341_s28 }
 0x3aa   : > { %p1708_p11 = pnand %p1715_p12, %p2636_p8 }
 0x3ac   : > { %p1709_p0 = pneg %p1708_p11 }
 0x3ae   : > { %1859 = dma.done.wait (%p1709_p0), %s1342_s29, 2432  }
 0x3af   : > { %1861 = vsyncadd (%p1709_p0), %s1342_s29, 4294964864  ;;  %p21_p1 = scmp.ge.s32.totalorder %s1962_s15, 4   ;;  %s2637_s30 = smov %s1868_s10 }
 0x3b0   : > { %s2638_s10 = smov %s1872_s11  ;;  %s2639_s11 = smov %s1973_s18 }
 0x3b1   : > { %s2640_s12 = smov %s1962_s15  ;;  %23 = sbr.rel (!%p21_p1) target bundleno = 5 (0x5), region = 100 }
 0x3b6   :  { %1347 = vsyncpa [#allocation3], 1 }
 0x3b7   :  { %1349 = vsyncpa [#allocation3 + $0x1], 1 }
 0x3b8   :  { %1350 = vsyncpa [#allocation6], 1 }
 0x3b9   :  { %1351 = vsyncpa [#allocation4], 1 }
 0x3ba   :  { %1353 = vsyncpa [#allocation4 + $0x1], 1 }

</bundles_post_ra>
